<compile_context>
chip_gen: v7x
topology: tpu7x:2x2x1
jax: 0.10.0
libtpu: 0.0.40
codegen_flags: <defaults>
</compile_context>

<pallas_src>
import functools

import jax
import jax.numpy as jnp
from jax.experimental import pallas as pl
from jax.experimental.pallas import tpu as pltpu

LN_EPS = 1e-5


def _round_up(x: int, m: int) -> int:
    return (x + m - 1) // m * m


def _cdiv(a: int, b: int) -> int:
    return -(-a // b)


def _pick_tile(n: int, tm: int) -> int:
    """Pick the row tile.

    Keeps the tile a power of two >= 256 (sublane/lane friendly), shrinks it
    so there are >= 2 grid steps whenever N allows (v7x megacore gets work on
    both TensorCores), and for small grids prefers an even step count so the
    two cores stay balanced.
    """
    tm_eff = max(256, tm)
    assert tm_eff % 256 == 0 and (tm_eff & (tm_eff - 1)) == 0, (
        "tm must be a power of two >= 256")
    # Ensure at least 2 grid steps when N is big enough.
    while tm_eff > 256 and n <= tm_eff:
        tm_eff //= 2
    # For small grids, prefer an even number of steps (v7x 2-TC balance).
    if tm_eff > 256:
        steps = _cdiv(n, tm_eff)
        if steps < 8 and steps % 2 == 1 and _cdiv(n, tm_eff // 2) % 2 == 0:
            tm_eff //= 2
    return tm_eff


def _pe_learned_kernel(x_ref, w1_ref, g_ref, beta_ref, w2_ref, b2_ref, o_ref):
    # --- Linear 1 on the MXU -------------------------------------------------
    # x is (tm, K8) f32 with a trailing ones column; w1 is (K8, H) f32 with b1
    # folded in as the matching row, so this single dot is x @ W1 + b1.
    h = jnp.dot(x_ref[...], w1_ref[...], preferred_element_type=jnp.float32)

    # --- LayerNorm over the feature (lane) axis, all in f32 -------------------
    # One-pass variance: E[h^2] - mean^2 (saves a full-width centered pass).
    mean = jnp.mean(h, axis=-1, keepdims=True)
    m2 = jnp.mean(h * h, axis=-1, keepdims=True)
    rstd = jax.lax.rsqrt(m2 - mean * mean + LN_EPS)
    h = (h - mean) * rstd
    h = h * g_ref[...] + beta_ref[...]

    # --- ReLU ------------------------------------------------------------------
    h = jnp.maximum(h, 0.0)

    # --- Linear 2 on the MXU ---------------------------------------------------
    # Operands in w2's dtype (bf16 fast path when the wrapper casts w2),
    # accumulation stays f32 via preferred_element_type.
    out = jnp.dot(h.astype(w2_ref.dtype), w2_ref[...],
                  preferred_element_type=jnp.float32)
    out = out + b2_ref[...]
    o_ref[...] = out.astype(o_ref.dtype)


@functools.partial(jax.jit,
                   static_argnames=("tm", "out_dtype", "matmul_dtype"))
def pe_learned(xyz, w1, b1, gamma, beta, w2, b2, *, tm=4096,
               out_dtype=jnp.bfloat16, matmul_dtype=jnp.bfloat16):
    """xyz: (N, C_in) -> (N, h_dim) positional embedding.

    Weights are (in, out) (transposed from torch's Linear storage).
    `out_dtype` defaults to bf16 to halve HBM writeback (the dominant traffic);
    pass jnp.float32 for strict numerics.  `matmul_dtype` controls the second
    matmul's operand dtype (bf16 default, f32 accumulation).
    """
    n, c_in = xyz.shape
    h_dim = w1.shape[1]

    out_dtype = jnp.dtype(out_dtype)
    matmul_dtype = jnp.dtype(matmul_dtype)

    # Pad the contraction dim of Linear-1 to a sublane multiple and fold b1 in
    # via an appended ones column.  This makes Linear-1 a clean MXU op, and
    # each per-row HBM->VMEM DMA is 32 B instead of 16 B.
    k_pad = max(8, _round_up(c_in + 1, 8))
    x_p = jnp.concatenate(
        [xyz.astype(jnp.float32),
         jnp.ones((n, 1), jnp.float32),
         jnp.zeros((n, k_pad - c_in - 1), jnp.float32)], axis=1)
    w1_p = jnp.concatenate(
        [w1.astype(jnp.float32),
         b1.reshape(1, h_dim).astype(jnp.float32),
         jnp.zeros((k_pad - c_in - 1, h_dim), jnp.float32)], axis=0)

    # LN affine / bias params as (1, H) so they tile cleanly in VMEM.
    gamma_2d = gamma.reshape(1, h_dim).astype(jnp.float32)
    beta_2d = beta.reshape(1, h_dim).astype(jnp.float32)
    b2_2d = b2.reshape(1, h_dim).astype(jnp.float32)
    # bf16 (or requested dtype) weights for the second MXU matmul.
    w2_m = w2.astype(matmul_dtype)

    # Ragged N handled by Pallas: partial last block's writes are masked, and
    # any garbage computed in the padded rows is row-local and discarded.
    tm_eff = _pick_tile(n, tm)
    grid = (_cdiv(n, tm_eff),)
    # VMEM budget at tm=4096: x 2x128KiB, out 2x1MiB (bf16), f32 intermediates
    # a few x 2MiB, params <0.2MiB  ->  well under the 32MiB scoped default.

    # Advisory cost estimate for XLA's scheduler.
    flops = 2 * n * h_dim * (k_pad + h_dim)
    bytes_accessed = (
        n * k_pad * 4                                     # padded input rows
        + n * h_dim * out_dtype.itemsize                  # output rows
        + k_pad * h_dim * 4 + h_dim * h_dim * matmul_dtype.itemsize  # weights
        + 3 * h_dim * 4)                                  # LN affine + b2
    cost = pl.CostEstimate(flops=flops, transcendentals=n,
                           bytes_accessed=bytes_accessed)

    return pl.pallas_call(
        _pe_learned_kernel,
        out_shape=jax.ShapeDtypeStruct((n, h_dim), out_dtype),
        grid_spec=pltpu.PrefetchScalarGridSpec(
            num_scalar_prefetch=0,
            grid=grid,
            in_specs=[
                # xyz tiled along rows; (padded) feature dim kept whole.
                pl.BlockSpec((tm_eff, k_pad), lambda i: (i, 0)),
                # Parameters: full arrays, constant block index -> DMA'd once.
                pl.BlockSpec((k_pad, h_dim), lambda i: (0, 0)),
                pl.BlockSpec((1, h_dim), lambda i: (0, 0)),
                pl.BlockSpec((1, h_dim), lambda i: (0, 0)),
                pl.BlockSpec((h_dim, h_dim), lambda i: (0, 0)),
                pl.BlockSpec((1, h_dim), lambda i: (0, 0)),
            ],
            out_specs=pl.BlockSpec((tm_eff, h_dim), lambda i: (i, 0)),
        ),
        compiler_params=pltpu.CompilerParams(
            dimension_semantics=("parallel",)),
        cost_estimate=cost,
    )(x_p, w1_p, gamma_2d, beta_2d, w2_m, b2_2d)


def pe_learned_reference(xyz, w1, b1, gamma, beta, w2, b2):
    """Plain-JAX f32 reference mirroring the PyTorch module."""
    h = xyz @ w1 + b1
    mean = jnp.mean(h, axis=-1, keepdims=True)
    var = jnp.mean((h - mean) ** 2, axis=-1, keepdims=True)
    h = (h - mean) * jax.lax.rsqrt(var + LN_EPS)
    h = h * gamma + beta
    h = jnp.maximum(h, 0.0)
    return h @ w2 + b2


if __name__ == "__main__":
    # Small, deterministic synthetic setup. N is deliberately NOT a multiple
    # of the tile to exercise the ragged (partial last block) path.
    N = 300            # number of points (e.g. flattened voxel coords)
    C_IN = 4           # input_channel
    H_DIM = 128        # kwargs['h_dim']

    key = jax.random.PRNGKey(0)
    k_x, k_w1, k_b1, k_w2, k_b2 = jax.random.split(key, 5)

    xyz = jax.random.normal(k_x, (N, C_IN), dtype=jnp.float32)

    # Deterministic parameter init (shapes from the module's __init__).
    w1 = jax.random.normal(k_w1, (C_IN, H_DIM), dtype=jnp.float32) * 0.1
    b1 = jax.random.normal(k_b1, (H_DIM,), dtype=jnp.float32) * 0.01
    gamma = jnp.ones((H_DIM,), dtype=jnp.float32)      # LayerNorm weight
    beta = jnp.zeros((H_DIM,), dtype=jnp.float32)      # LayerNorm bias
    w2 = jax.random.normal(k_w2, (H_DIM, H_DIM), dtype=jnp.float32) * 0.1
    b2 = jax.random.normal(k_b2, (H_DIM,), dtype=jnp.float32) * 0.01

    ref = pe_learned_reference(xyz, w1, b1, gamma, beta, w2, b2)

    # 1) Full-precision path (f32 matmuls, f32 output): tight tolerance.
    out_f32 = pe_learned(xyz, w1, b1, gamma, beta, w2, b2,
                         out_dtype=jnp.float32, matmul_dtype=jnp.float32)
    out_f32 = jax.block_until_ready(out_f32)
    assert out_f32.shape == (N, H_DIM)
    assert jnp.allclose(out_f32, ref, atol=2e-4, rtol=2e-4), \
        "f32 path mismatch vs reference"

    # 2) Default fast path (bf16 Linear-2 operands, bf16 output): looser tol.
    out_bf = pe_learned(xyz, w1, b1, gamma, beta, w2, b2)
    out_bf = jax.block_until_ready(out_bf)
    assert out_bf.shape == (N, H_DIM)
    assert out_bf.dtype == jnp.bfloat16
    max_err = float(jnp.max(jnp.abs(out_bf.astype(jnp.float32) - ref)))
    assert max_err < 1e-1, f"bf16 path mismatch, max abs err {max_err}"

    print("KERNEL_OK")
</pallas_src>

<mosaic_0001>
module attributes {stable_mosaic.version = 11 : i64} {
  func.func @_pe_learned_kernel(%arg0: i32, %arg1: memref<256x8xf32, #tpu.memory_space<vmem>>, %arg2: memref<8x128xf32, #tpu.memory_space<vmem>>, %arg3: memref<1x128xf32, #tpu.memory_space<vmem>>, %arg4: memref<1x128xf32, #tpu.memory_space<vmem>>, %arg5: memref<128x128xf32, #tpu.memory_space<vmem>>, %arg6: memref<1x128xf32, #tpu.memory_space<vmem>>, %arg7: memref<256x128xf32, #tpu.memory_space<vmem>>) attributes {dimension_semantics = [#tpu.dimension_semantics<parallel>], iteration_bounds = array<i64: 2>, scalar_prefetch = 0 : i64, scratch_operands = 0 : i64, tpu.core_type = #tpu.core_type<tc>, window_params = [{transform_indices = @transform_0, window_bounds = array<i64: 256, 8>}, {pipeline_mode = #tpu.pipeline_mode<synchronous>, transform_indices = @transform_1, window_bounds = array<i64: 8, 128>}, {pipeline_mode = #tpu.pipeline_mode<synchronous>, transform_indices = @transform_2, window_bounds = array<i64: 1, 128>}, {pipeline_mode = #tpu.pipeline_mode<synchronous>, transform_indices = @transform_3, window_bounds = array<i64: 1, 128>}, {pipeline_mode = #tpu.pipeline_mode<synchronous>, transform_indices = @transform_4, window_bounds = array<i64: 128, 128>}, {pipeline_mode = #tpu.pipeline_mode<synchronous>, transform_indices = @transform_5, window_bounds = array<i64: 1, 128>}, {transform_indices = @transform_6, window_bounds = array<i64: 256, 128>}]} {
    %c0 = arith.constant 0 : index
    %c0_0 = arith.constant 0 : index
    %0 = vector.load %arg1[%c0, %c0_0] : memref<256x8xf32, #tpu.memory_space<vmem>>, vector<256x8xf32>
    %c0_1 = arith.constant 0 : index
    %c0_2 = arith.constant 0 : index
    %1 = vector.load %arg2[%c0_1, %c0_2] : memref<8x128xf32, #tpu.memory_space<vmem>>, vector<8x128xf32>
    %cst = arith.constant dense<0.000000e+00> : vector<256x128xf32>
    %2 = tpu.matmul %0, %1, %cst {dimension_numbers = #tpu.dot_dimension_numbers<[1], [0], [0], [1], [0, 0, 1, 1], [], []>} : vector<256x8xf32>, vector<8x128xf32>, vector<256x128xf32> -> vector<256x128xf32>
    %cst_3 = arith.constant dense<0.000000e+00> : vector<256xf32>
    %3 = vector.multi_reduction <add>, %2, %cst_3 [1] : vector<256x128xf32> to vector<256xf32>
    %4 = vector.shape_cast %3 : vector<256xf32> to vector<256x1xf32>
    %cst_4 = arith.constant 1.280000e+02 : f32
    %5 = vector.broadcast %cst_4 : f32 to vector<256x1xf32>
    %6 = arith.divf %4, %5 : vector<256x1xf32>
    %7 = arith.mulf %2, %2 : vector<256x128xf32>
    %cst_5 = arith.constant dense<0.000000e+00> : vector<256xf32>
    %8 = vector.multi_reduction <add>, %7, %cst_5 [1] : vector<256x128xf32> to vector<256xf32>
    %9 = vector.shape_cast %8 : vector<256xf32> to vector<256x1xf32>
    %cst_6 = arith.constant 1.280000e+02 : f32
    %10 = vector.broadcast %cst_6 : f32 to vector<256x1xf32>
    %11 = arith.divf %9, %10 : vector<256x1xf32>
    %12 = arith.mulf %6, %6 : vector<256x1xf32>
    %13 = arith.subf %11, %12 : vector<256x1xf32>
    %cst_7 = arith.constant 9.99999974E-6 : f32
    %14 = vector.broadcast %cst_7 : f32 to vector<256x1xf32>
    %15 = arith.addf %13, %14 : vector<256x1xf32>
    %16 = math.rsqrt %15 : vector<256x1xf32>
    %17 = vector.broadcast %6 : vector<256x1xf32> to vector<256x128xf32>
    %18 = arith.subf %2, %17 : vector<256x128xf32>
    %19 = vector.broadcast %16 : vector<256x1xf32> to vector<256x128xf32>
    %20 = arith.mulf %18, %19 : vector<256x128xf32>
    %c0_8 = arith.constant 0 : index
    %c0_9 = arith.constant 0 : index
    %21 = vector.load %arg3[%c0_8, %c0_9] : memref<1x128xf32, #tpu.memory_space<vmem>>, vector<1x128xf32>
    %22 = vector.broadcast %21 : vector<1x128xf32> to vector<256x128xf32>
    %23 = arith.mulf %20, %22 : vector<256x128xf32>
    %c0_10 = arith.constant 0 : index
    %c0_11 = arith.constant 0 : index
    %24 = vector.load %arg4[%c0_10, %c0_11] : memref<1x128xf32, #tpu.memory_space<vmem>>, vector<1x128xf32>
    %25 = vector.broadcast %24 : vector<1x128xf32> to vector<256x128xf32>
    %26 = arith.addf %23, %25 : vector<256x128xf32>
    %cst_12 = arith.constant 0.000000e+00 : f32
    %27 = vector.broadcast %cst_12 : f32 to vector<256x128xf32>
    %28 = arith.maximumf %26, %27 : vector<256x128xf32>
    %c0_13 = arith.constant 0 : index
    %c0_14 = arith.constant 0 : index
    %29 = vector.load %arg5[%c0_13, %c0_14] : memref<128x128xf32, #tpu.memory_space<vmem>>, vector<128x128xf32>
    %cst_15 = arith.constant dense<0.000000e+00> : vector<256x128xf32>
    %30 = tpu.matmul %28, %29, %cst_15 {dimension_numbers = #tpu.dot_dimension_numbers<[1], [0], [0], [1], [0, 0, 1, 1], [], []>} : vector<256x128xf32>, vector<128x128xf32>, vector<256x128xf32> -> vector<256x128xf32>
    %c0_16 = arith.constant 0 : index
    %c0_17 = arith.constant 0 : index
    %31 = vector.load %arg6[%c0_16, %c0_17] : memref<1x128xf32, #tpu.memory_space<vmem>>, vector<1x128xf32>
    %32 = vector.broadcast %31 : vector<1x128xf32> to vector<256x128xf32>
    %33 = arith.addf %30, %32 : vector<256x128xf32>
    %c0_18 = arith.constant 0 : index
    %c0_19 = arith.constant 0 : index
    %34 = vector.load %arg7[%c0_18, %c0_19] : memref<256x128xf32, #tpu.memory_space<vmem>>, vector<256x128xf32>
    tpu.vector_store %arg7[%c0_18, %c0_19], %33 {strides = array<i32>} : memref<256x128xf32, #tpu.memory_space<vmem>>, vector<256x128xf32>,
    return
  }
  func.func @transform_0(%arg0: i32) -> (i32, i32) {
    %c0_i32 = arith.constant 0 : i32
    %c0_i32_0 = arith.constant 0 : i32
    return %arg0, %c0_i32 : i32, i32
  }
  func.func @transform_1(%arg0: i32) -> (i32, i32) {
    %c0_i32 = arith.constant 0 : i32
    %c0_i32_0 = arith.constant 0 : i32
    %c0_i32_1 = arith.constant 0 : i32
    return %c0_i32, %c0_i32_0 : i32, i32
  }
  func.func @transform_2(%arg0: i32) -> (i32, i32) {
    %c0_i32 = arith.constant 0 : i32
    %c0_i32_0 = arith.constant 0 : i32
    %c0_i32_1 = arith.constant 0 : i32
    return %c0_i32, %c0_i32_0 : i32, i32
  }
  func.func @transform_3(%arg0: i32) -> (i32, i32) {
    %c0_i32 = arith.constant 0 : i32
    %c0_i32_0 = arith.constant 0 : i32
    %c0_i32_1 = arith.constant 0 : i32
    return %c0_i32, %c0_i32_0 : i32, i32
  }
  func.func @transform_4(%arg0: i32) -> (i32, i32) {
    %c0_i32 = arith.constant 0 : i32
    %c0_i32_0 = arith.constant 0 : i32
    %c0_i32_1 = arith.constant 0 : i32
    return %c0_i32, %c0_i32_0 : i32, i32
  }
  func.func @transform_5(%arg0: i32) -> (i32, i32) {
    %c0_i32 = arith.constant 0 : i32
    %c0_i32_0 = arith.constant 0 : i32
    %c0_i32_1 = arith.constant 0 : i32
    return %c0_i32, %c0_i32_0 : i32, i32
  }
  func.func @transform_6(%arg0: i32) -> (i32, i32) {
    %c0_i32 = arith.constant 0 : i32
    %c0_i32_0 = arith.constant 0 : i32
    return %arg0, %c0_i32 : i32, i32
  }
}

</mosaic_0001>

<bundles_post_ra>
// kernel: pe_learned.1
= control target key start
LH: loop header
LB: loop body
LE: loop exit
PB: predicated region body
PF: predicated region fallthrough
CT: control target
= control target key end

     0   :  { %11 = vsyncpa [#allocation3], 0  ;;  %s2749_s0 = inlined_call_operand.vmem [shape: f32[300,8], index: 0, kind: input, shape index: {}]   ;;  %s2750_s1 = inlined_call_operand.vmem [shape: f32[8,128], index: 1, kind: input, shape index: {}]   ;;  %s2751_s2 = inlined_call_operand.vmem [shape: f32[1,128], index: 2, kind: input, shape index: {}]   ;;  %s2752_s3 = inlined_call_operand.vmem [shape: f32[1,128], index: 3, kind: input, shape index: {}]   ;;  %s2753_s4 = inlined_call_operand.vmem [shape: f32[128,128], index: 4, kind: input, shape index: {}]   ;;  %s2754_s5 = inlined_call_operand.vmem [shape: f32[1,128], index: 5, kind: input, shape index: {}]   ;;  %s2755_s6 = inlined_call_operand.hbm [shape: f32[300,128], index: 6, kind: output, shape index: {}]  }
   0x1   :  { %13 = vsyncpa [#allocation3 + $0x1], 0  ;;  %s2038_s21 = smov 0   ;;  %s2040_s22 = smov 0  }
   0x2   :  { %s2042_s23 = smov 0   ;;  %s2044_s24 = smov 0  }
   0x3 LB: > { %s2059_s25 = sadd.s32 4294967295, %s1998_s24   ;;  %s1521_s26 = sadd.s32 4294967294, %s1998_s24   ;;  %s1998_s24 = sphi %s2044_s24, %s2761_s24   ;;  %s1994_s23 = sphi %s2042_s23, %s2760_s23   ;;  %s1990_s22 = sphi %s2040_s22, %s2759_s22   ;;  %s1986_s21 = sphi %s2038_s21, %s2758_s21  }
   0x4   : > { %s2063_s27 = sadd.s32 1, %s1998_s24   ;;  %s157_s28 = sadd.s32 1, %s1994_s23 }
   0x5   : > { %s154_s29 = ssub.s32 %s1998_s24, %s2063_s27  ;;  %p167_p0 = scmp.ne.s32.totalorder %s1994_s23, %s1990_s22 }
   0x6   : > { %p155_p1 = scmp.eq.s32.totalorder %s154_s29, 0  ;;  %p168_p2 = scmp.eq.s32.totalorder %s2059_s25, 1 }
   0x7   : > { %p173_p3 = scmp.ne.s32.totalorder %s1990_s22, %s1986_s21  ;;  %p174_p4 = scmp.eq.s32.totalorder %s1521_s26, 1 }
   0x8   : > { %s2074_s30 = scalar_select %p155_p1, %s1994_s23, %s157_s28  }
   0x9   : > { %p2076_p5 = por %p168_p2, %p167_p0  ;;  %p2080_p6 = por %p174_p4, %p173_p3 }
   0xa   : > { %p1524_p7 = scmp.ge.s32.totalorder %s1998_s24, 1  ;;  %p224_p8 = scmp.lt.s32.totalorder %s1998_s24, 3 }
   0xc   : > { %p225_p9 = pnand %p1524_p7, %p224_p8 }
   0xd   : > { %v309_v0 = vld [vmem:[%s2750_s1] sm:$0xff] (!%p225_p9)  ;;  %s2090_s11 = sshll.u32 (!%p225_p9), %s2059_s25, 5  ;;  %vm310_vm0 = vcmask (!%p225_p9), 64512   ;;  %v1160_v48 = vld [vmem:[%s2753_s4 + $0x8] sm:$0xff] (!%p225_p9)  ;;  %v1161_v52 = vld [vmem:[%s2753_s4 + $0x10] sm:$0xff] (!%p225_p9)  ;;  %s255_s10 = sand.u32 (!%p225_p9), 1, %s1990_s22  }
   0xe   : > { %228 = sbr.rel (%p225_p9) target bundleno = 788 (0x314), region = 44  ;;  %1654 = vmatprep.subr.mxu0 (!%p225_p9), %v309_v0  ;;  %p263_p10 = scmp.lt.s32.totalorder (!%p225_p9), %s2090_s11, 37  ;;  %v1159_v47 = vld [vmem:[%s2753_s4] sm:$0xff] (!%p225_p9)  ;;  %v1162_v53 = vld [vmem:[%s2753_s4 + $0x18] sm:$0xff] (!%p225_p9)  ;;  %v1164_v60 = vld [vmem:[%s2753_s4 + $0x28] sm:$0xff] (!%p225_p9) }
   0xf   : > { %1655 = vmatpush3.msra.mxu0 (!%p225_p9), %v309_v0  ;;  %v1784_v49 = vpack.c.bf16 (!%p225_p9), %v1160_v48, %v1159_v47  ;;  %v1788_v55 = vpack.c.bf16 (!%p225_p9), %v1162_v53, %v1161_v52  ;;  %v1163_v59 = vld [vmem:[%s2753_s4 + $0x20] sm:$0xff] (!%p225_p9) }
  0x10   : > { %v1792_v62 = vpack.c.bf16 (!%p225_p9), %v1164_v60, %v1163_v59 }
  0x11   : > { %1785 = vmatprep.subr.bf16.mxu0 (!%p225_p9), %v1784_v49  ;;  %1816 = vmatprep.subr.bf16.mxu1 (!%p225_p9), %v1784_v49 }
  0x12   : > { %1824 = vmatpush3.bf16.msra.mxu1 (!%p225_p9), %v1784_v49 }
  0x13   : > { %1817 = vmatprep.subr.bf16.mxu1 (!%p225_p9), %v1788_v55 }
  0x15   : > { %s264_s12 = scalar_select %p263_p10, %s2090_s11, 37 }
  0x16   : > { %1825 = vmatpush3.bf16.msra.mxu1 %v1788_v55  ;;  %s1448_s17 = ssub.s32 (%p2076_p5), 38, %s2090_s11 }
  0x17   : > { %s1527_s13 = sshll.u32 %s264_s12, 3  ;;  %1818 = vmatprep.subr.bf16.mxu1 %v1792_v62  ;;  %s1525_s12 = sshll.u32 %s255_s10, 8 }
  0x18   : > { %s2097_s16 = scalar_lea.vmem %s2749_s0, %s1527_s13  ;;  %s2622_s15 = scalar_lea.vmem [#allocation2], %s1525_s12 }
  0x19   : > { %v277_v1 = vld [vmem:[%s2097_s16] sm:$0xff]  ;;  %v278_v2 = vld [vmem:[%s2097_s16 + $0x8] sm:$0xff]  ;;  %v279_v3 = vld [vmem:[%s2097_s16 + $0x10] sm:$0xff]  ;;  %p1449_p11 = scmp.lt.s32.totalorder (%p2076_p5), %s1448_s17, 32 }
  0x1a   : > { %1656 = vmatprep.mubr.msk.f32.mxu0 %vm310_vm0, %v277_v1  ;;  %v280_v4 = vld [vmem:[%s2097_s16 + $0x18] sm:$0xff]  ;;  %v281_v5 = vld [vmem:[%s2097_s16 + $0x20] sm:$0xff]  ;;  %v282_v6 = vld [vmem:[%s2097_s16 + $0x28] sm:$0xff]  ;;  %1826 = vmatpush3.bf16.msra.mxu1 %v1792_v62 }
  0x1b   : > { %1657 = vmatmul.mubr.msk.f32.vlgmr.msra.gmra.mrb[0].mxu0 %vm310_vm0, %v278_v2  ;;  %v283_v7 = vld [vmem:[%s2097_s16 + $0x30] sm:$0xff]  ;;  %v284_v8 = vld [vmem:[%s2097_s16 + $0x38] sm:$0xff]  ;;  %v285_v9 = vld [vmem:[%s2097_s16 + $0x40] sm:$0xff] }
  0x1c   : > { %1659 = vmatprep.mubr.msk.f32.mxu0 %vm310_vm0, %v279_v3  ;;  %v286_v10 = vld [vmem:[%s2097_s16 + $0x48] sm:$0xff]  ;;  %v287_v11 = vld [vmem:[%s2097_s16 + $0x50] sm:$0xff]  ;;  %v288_v12 = vld [vmem:[%s2097_s16 + $0x58] sm:$0xff]  ;;  %1787 = vmatpush3.bf16.msra.mxu0 %v1784_v49 }
  0x1d   : > { %v289_v13 = vld [vmem:[%s2097_s16 + $0x60] sm:$0xff]  ;;  %v290_v14 = vld [vmem:[%s2097_s16 + $0x68] sm:$0xff]  ;;  %v291_v15 = vld [vmem:[%s2097_s16 + $0x70] sm:$0xff]  ;;  %1789 = vmatprep.subr.bf16.mxu0 %v1788_v55 }
  0x1e   : > { %v292_v16 = vld [vmem:[%s2097_s16 + $0x78] sm:$0xff]  ;;  %v293_v17 = vld [vmem:[%s2097_s16 + $0x80] sm:$0xff]  ;;  %v294_v18 = vld [vmem:[%s2097_s16 + $0x88] sm:$0xff] }
  0x1f   : > { %1660 = vmatmul.mubr.msk.f32.gmra.mrb[2].mxu0 %vm310_vm0, %v280_v4  ;;  %v295_v19 = vld [vmem:[%s2097_s16 + $0x90] sm:$0xff]  ;;  %v296_v20 = vld [vmem:[%s2097_s16 + $0x98] sm:$0xff]  ;;  %v297_v21 = vld [vmem:[%s2097_s16 + $0xa0] sm:$0xff] }
  0x20   : > { %1662 = vmatprep.mubr.msk.f32.mxu0 %vm310_vm0, %v281_v5  ;;  %v298_v22 = vld [vmem:[%s2097_s16 + $0xa8] sm:$0xff]  ;;  %v299_v23 = vld [vmem:[%s2097_s16 + $0xb0] sm:$0xff]  ;;  %v300_v24 = vld [vmem:[%s2097_s16 + $0xb8] sm:$0xff]  ;;  %1791 = vmatpush3.bf16.msra.mxu0 %v1788_v55 }
  0x21   : > { %v301_v25 = vld [vmem:[%s2097_s16 + $0xc0] sm:$0xff]  ;;  %v302_v26 = vld [vmem:[%s2097_s16 + $0xc8] sm:$0xff]  ;;  %v303_v27 = vld [vmem:[%s2097_s16 + $0xd0] sm:$0xff]  ;;  %1793 = vmatprep.subr.bf16.mxu0 %v1792_v62 }
  0x22   : > { %v304_v28 = vld [vmem:[%s2097_s16 + $0xd8] sm:$0xff]  ;;  %v305_v29 = vld [vmem:[%s2097_s16 + $0xe0] sm:$0xff]  ;;  %v306_v30 = vld [vmem:[%s2097_s16 + $0xe8] sm:$0xff] }
  0x23   : > { %1663 = vmatmul.mubr.msk.f32.gmra.mrb[4].mxu0 %vm310_vm0, %v282_v6  ;;  %v307_v31 = vld [vmem:[%s2097_s16 + $0xf0] sm:$0xff]  ;;  %v308_v32 = vld [vmem:[%s2097_s16 + $0xf8] sm:$0xff]  ;;  %s2688_s16 = scalar_lea.sflag [#allocation3], %s255_s10 }
  0x24   : > { %1665 = vmatprep.mubr.msk.f32.mxu0 %vm310_vm0, %v283_v7  ;;  %1795 = vmatpush3.bf16.msra.mxu0 %v1792_v62  ;;  %v1165_v1 = vld [vmem:[%s2753_s4 + $0x30] sm:$0xff]  ;;  %v1166_v2 = vld [vmem:[%s2753_s4 + $0x38] sm:$0xff]  ;;  %v1167_v7 = vld [vmem:[%s2753_s4 + $0x40] sm:$0xff] }
  0x25   : > { %v1796_v3 = vpack.c.bf16 %v1166_v2, %v1165_v1 }
  0x27   : > { %1666 = vmatmul.mubr.msk.f32.gmra.mrb[6].mxu0 %vm310_vm0, %v284_v8  ;;  %1797 = vmatprep.subr.bf16.mxu0 %v1796_v3  ;;  %v1168_v8 = vld [vmem:[%s2753_s4 + $0x48] sm:$0xff] }
  0x28   : > { %1668 = vmatprep.mubr.msk.f32.mxu0 %vm310_vm0, %v285_v9  ;;  %1799 = vmatpush3.bf16.msra.mxu0 %v1796_v3  ;;  %v1800_v9 = vpack.c.bf16 %v1168_v8, %v1167_v7 }
  0x29   : > { %1819 = vmatprep.subr.bf16.mxu1 %v1796_v3 }
  0x2a   : > { %1827 = vmatpush3.bf16.msra.mxu1 %v1796_v3  ;;  %1801 = vmatprep.subr.bf16.mxu0 %v1800_v9 }
  0x2b   : > { %1669 = vmatmul.mubr.msk.f32.gmra.mrb[8].mxu0 %vm310_vm0, %v286_v10  ;;  %1820 = vmatprep.subr.bf16.mxu1 %v1800_v9 }
  0x2c   : > { %1671 = vmatprep.mubr.msk.f32.mxu0 %vm310_vm0, %v287_v11  ;;  %1803 = vmatpush3.bf16.msra.mxu0 %v1800_v9 }
  0x2e   : > { %1828 = vmatpush3.bf16.msra.mxu1 %v1800_v9 }
  0x2f   : > { %1672 = vmatmul.mubr.msk.f32.gmra.mrb[10].mxu0 %vm310_vm0, %v288_v12  ;;  %v1169_v12 = vld [vmem:[%s2753_s4 + $0x50] sm:$0xff] }
  0x30   : > { %1674 = vmatprep.mubr.msk.f32.mxu0 %vm310_vm0, %v289_v13  ;;  %v1170_v13 = vld [vmem:[%s2753_s4 + $0x58] sm:$0xff] }
  0x33   : > { %1675 = vmatmul.mubr.msk.f32.gmra.mrb[12].mxu0 %vm310_vm0, %v290_v14  ;;  %v1804_v14 = vpack.c.bf16 %v1170_v13, %v1169_v12 }
  0x34   : > { %1677 = vmatprep.mubr.msk.f32.mxu0 %vm310_vm0, %v291_v15 }
  0x35   : > { %1805 = vmatprep.subr.bf16.mxu0 %v1804_v14  ;;  %1821 = vmatprep.subr.bf16.mxu1 %v1804_v14 }
  0x36   : > { %1807 = vmatpush3.bf16.msra.mxu0 %v1804_v14  ;;  %1829 = vmatpush3.bf16.msra.mxu1 %v1804_v14 }
  0x37   : > { %1678 = vmatmul.mubr.msk.f32.gmra.mrb[14].mxu0 %vm310_vm0, %v292_v16 }
  0x38   : > { %1680 = vmatprep.mubr.msk.f32.mxu0 %vm310_vm0, %v293_v17 }
  0x3b   : > { %1681 = vmatmul.mubr.msk.f32.gmra.mrb[16].mxu0 %vm310_vm0, %v294_v18  ;;  %v1171_v18 = vld [vmem:[%s2753_s4 + $0x60] sm:$0xff] }
  0x3c   : > { %1683 = vmatprep.mubr.msk.f32.mxu0 %vm310_vm0, %v295_v19  ;;  %v1172_v19 = vld [vmem:[%s2753_s4 + $0x68] sm:$0xff] }
  0x3f   : > { %1684 = vmatmul.mubr.msk.f32.gmra.mrb[18].mxu0 %vm310_vm0, %v296_v20 }
  0x40   : > { %1686 = vmatprep.mubr.msk.f32.mxu0 %vm310_vm0, %v297_v21  ;;  %v1808_v21 = vpack.c.bf16 %v1172_v19, %v1171_v18 }
  0x42   : > { %1809 = vmatprep.subr.bf16.mxu0 %v1808_v21  ;;  %1822 = vmatprep.subr.bf16.mxu1 %v1808_v21 }
  0x43   : > { %1687 = vmatmul.mubr.msk.f32.gmra.mrb[20].mxu0 %vm310_vm0, %v298_v22  ;;  %1830 = vmatpush3.bf16.msra.mxu1 %v1808_v21 }
  0x44   : > { %1689 = vmatprep.mubr.msk.f32.mxu0 %vm310_vm0, %v299_v23  ;;  %1811 = vmatpush3.bf16.msra.mxu0 %v1808_v21 }
  0x47   : > { %1690 = vmatmul.mubr.msk.f32.gmra.mrb[22].mxu0 %vm310_vm0, %v300_v24  ;;  %v1173_v24 = vld [vmem:[%s2753_s4 + $0x70] sm:$0xff] }
  0x48   : > { %1692 = vmatprep.mubr.msk.f32.mxu0 %vm310_vm0, %v301_v25  ;;  %v1174_v25 = vld [vmem:[%s2753_s4 + $0x78] sm:$0xff] }
  0x4b   : > { %1693 = vmatmul.mubr.msk.f32.gmra.mrb[24].mxu0 %vm310_vm0, %v302_v26 }
  0x4c   : > { %1695 = vmatprep.mubr.msk.f32.mxu0 %vm310_vm0, %v303_v27  ;;  %v1812_v27 = vpack.c.bf16 %v1174_v25, %v1173_v24 }
  0x4e   : > { %1813 = vmatprep.subr.bf16.mxu0 %v1812_v27  ;;  %1823 = vmatprep.subr.bf16.mxu1 %v1812_v27 }
  0x4f   : > { %1696 = vmatmul.mubr.msk.f32.gmra.mrb[26].mxu0 %vm310_vm0, %v304_v28  ;;  %1831 = vmatpush3.bf16.msra.mxu1 %v1812_v27 }
  0x50   : > { %1698 = vmatprep.mubr.msk.f32.mxu0 %vm310_vm0, %v305_v29  ;;  %1815 = vmatpush3.bf16.msra.mxu0 %v1812_v27 }
  0x53   : > { %1699 = vmatmul.mubr.msk.f32.gmra.mrb[28].mxu0 %vm310_vm0, %v306_v30 }
  0x54   : > { %1701 = vmatprep.mubr.msk.f32.mxu0 %vm310_vm0, %v307_v31 }
  0x57   : > { %1702 = vmatmul.mubr.msk.f32.gmra.mrb[30].mxu0 %vm310_vm0, %v308_v32 }
  0xee   : > { %v2163_v33 = vpop.f32.mrb[0].mxu0 }
  0xef   : > { %634 = vadd.xlane.f32.xlu0 %v2163_v33  ;;  %v2166_v34 = vpop.f32.mrb[1].mxu0  ;;  %v730_v37 = vmul.f32 %v2163_v33, %v2163_v33 }
  0xf0   : > { %v729_v40 = vmul.f32 %v2166_v34, %v2166_v34 }
  0xf2   : > { %v2168_v35 = vpop.f32.mrb[2].mxu0 }
  0xf3   : > { %632 = vadd.xlane.f32.xlu0 %v2166_v34  ;;  %v2171_v36 = vpop.f32.mrb[3].mxu0  ;;  %v732_v54 = vmul.f32 %v2168_v35, %v2168_v35 }
  0xf4   : > { %v731_v61 = vmul.f32 %v2171_v36, %v2171_v36 }
  0xf6   : > { %v2175_v38 = vpop.f32.mrb[4].mxu0 }
  0xf7   : > { %763 = vadd.xlane.f32.xlu0 %v730_v37  ;;  %v2177_v39 = vpop.f32.mrb[5].mxu0  ;;  %v734_v8 = vmul.f32 %v2175_v38, %v2175_v38 }
  0xfa   : > { %v2181_v41 = vpop.f32.mrb[6].mxu0 }
  0xfb   : > { %761 = vadd.xlane.f32.xlu0 %v729_v40  ;;  %v2183_v42 = vpop.f32.mrb[7].mxu0  ;;  %v736_v43 = vmul.f32 %v2181_v41, %v2181_v41 }
  0xfc   : > { %v735_v45 = vmul.f32 %v2183_v42, %v2183_v42 }
  0xfd   : > { %775 = vadd.xlane.f32.xlu1 %v736_v43 }
  0xfe   : > { %v2187_v44 = vpop.f32.mrb[8].mxu0 }
  0xff   : > { %638 = vadd.xlane.f32.xlu0 %v2168_v35  ;;  %v2192_v46 = vpop.f32.mrb[9].mxu0  ;;  %v738_v57 = vmul.f32 %v2187_v44, %v2187_v44 }
 0x100   : > { %v737_v20 = vmul.f32 %v2192_v46, %v2192_v46 }
 0x101   : > { %773 = vadd.xlane.f32.xlu1 %v735_v45 }
 0x102   : > { %v2200_v50 = vpop.f32.mrb[10].mxu0 }
 0x103   : > { %636 = vadd.xlane.f32.xlu0 %v2171_v36  ;;  %v2203_v51 = vpop.f32.mrb[11].mxu0  ;;  %v740_v5 = vmul.f32 %v2200_v50, %v2200_v50 }
 0x104   : > { %v739_v30 = vmul.f32 %v2203_v51, %v2203_v51 }
 0x105   : > { %650 = vadd.xlane.f32.xlu1 %v2187_v44 }
 0x106   : > { %v2214_v56 = vpop.f32.mrb[12].mxu0 }
 0x107   : > { %767 = vadd.xlane.f32.xlu0 %v732_v54  ;;  %v2218_v58 = vpop.f32.mrb[13].mxu0  ;;  %v742_v16 = vmul.f32 %v2214_v56, %v2214_v56 }
 0x108   : > { %v741_v45 = vmul.f32 %v2218_v58, %v2218_v58 }
 0x109   : > { %779 = vadd.xlane.f32.xlu1 %v738_v57 }
 0x10a   : > { %v2228_v63 = vpop.f32.mrb[14].mxu0 }
 0x10b   : > { %765 = vadd.xlane.f32.xlu0 %v731_v61  ;;  %v2230_v0 = vpop.f32.mrb[15].mxu0  ;;  %v744_v28 = vmul.f32 %v2228_v63, %v2228_v63 }
 0x10c   : > { %v743_v52 = vmul.f32 %v2230_v0, %v2230_v0 }
 0x10d   : > { %654 = vadd.xlane.f32.xlu1 %v2200_v50 }
 0x10e   : > { %v2239_v4 = vpop.f32.mrb[16].mxu0 }
 0x10f   : > { %646 = vadd.xlane.f32.xlu0 %v2181_v41  ;;  %v2244_v6 = vpop.f32.mrb[17].mxu0  ;;  %v746_v40 = vmul.f32 %v2239_v4, %v2239_v4 }
 0x110   : > { %v745_v54 = vmul.f32 %v2244_v6, %v2244_v6 }
 0x111   : > { %783 = vadd.xlane.f32.xlu1 %v740_v5  ;;  %v733_v5 = vmul.f32 %v2177_v39, %v2177_v39 }
 0x112   : > { %v2252_v10 = vpop.f32.mrb[18].mxu0 }
 0x113   : > { %644 = vadd.xlane.f32.xlu0 %v2183_v42  ;;  %v2255_v11 = vpop.f32.mrb[19].mxu0  ;;  %v748_v49 = vmul.f32 %v2252_v10, %v2252_v10 }
 0x114   : > { %v747_v57 = vmul.f32 %v2255_v11, %v2255_v11 }
 0x115   : > { %658 = vadd.xlane.f32.xlu1 %v2214_v56 }
 0x116   : > { %v2264_v15 = vpop.f32.mrb[20].mxu0 }
 0x117   : > { %648 = vadd.xlane.f32.xlu0 %v2192_v46  ;;  %v2269_v17 = vpop.f32.mrb[21].mxu0  ;;  %v750_v53 = vmul.f32 %v2264_v15, %v2264_v15 }
 0x118   : > { %v749_v60 = vmul.f32 %v2269_v17, %v2269_v17 }
 0x119   : > { %787 = vadd.xlane.f32.xlu1 %v742_v16 }
 0x11a   : > { %v2279_v22 = vpop.f32.mrb[22].mxu0 }
 0x11b   : > { %777 = vadd.xlane.f32.xlu0 %v737_v20  ;;  %v2281_v23 = vpop.f32.mrb[23].mxu0  ;;  %v752_v55 = vmul.f32 %v2279_v22, %v2279_v22 }
 0x11c   : > { %v751_v61 = vmul.f32 %v2281_v23, %v2281_v23 }
 0x11d   : > { %662 = vadd.xlane.f32.xlu1 %v2228_v63 }
 0x11e   : > { %v2290_v26 = vpop.f32.mrb[24].mxu0 }
 0x11f   : > { %652 = vadd.xlane.f32.xlu0 %v2203_v51  ;;  %v2295_v29 = vpop.f32.mrb[25].mxu0  ;;  %v754_v59 = vmul.f32 %v2290_v26, %v2290_v26 }
 0x120   : > { %v753_v2 = vmul.f32 %v2295_v29, %v2295_v29 }
 0x121   : > { %791 = vadd.xlane.f32.xlu1 %v744_v28 }
 0x122   : > { %v2299_v31 = vpop.f32.mrb[26].mxu0 }
 0x123   : > { %781 = vadd.xlane.f32.xlu0 %v739_v30  ;;  %v2301_v32 = vpop.f32.mrb[27].mxu0  ;;  %v756_v62 = vmul.f32 %v2299_v31, %v2299_v31 }
 0x124   : > { %v755_v1 = vmul.f32 %v2301_v32, %v2301_v32 }
 0x125   : > { %666 = vadd.xlane.f32.xlu1 %v2239_v4 }
 0x126   : > { %v2304_v37 = vpop.f32.mrb[28].mxu0 }
 0x127   : > { %656 = vadd.xlane.f32.xlu0 %v2218_v58  ;;  %v2309_v43 = vpop.f32.mrb[29].mxu0  ;;  %v758_v3 = vmul.f32 %v2304_v37, %v2304_v37 }
 0x128   : > { %v757_v7 = vmul.f32 %v2309_v43, %v2309_v43 }
 0x129   : > { %795 = vadd.xlane.f32.xlu1 %v746_v40 }
 0x12a   : > { %v2313_v47 = vpop.f32.mrb[30].mxu0 }
 0x12b   : > { %785 = vadd.xlane.f32.xlu0 %v741_v45  ;;  %v2315_v48 = vpop.f32.mrb[31].mxu0  ;;  %v760_v12 = vmul.f32 %v2313_v47, %v2313_v47 }
 0x12c   : > { %v759_v9 = vmul.f32 %v2315_v48, %v2315_v48 }
 0x12d   : > { %670 = vadd.xlane.f32.xlu1 %v2252_v10 }
 0x12f   : > { %660 = vadd.xlane.f32.xlu0 %v2230_v0 }
 0x131   : > { %799 = vadd.xlane.f32.xlu1 %v748_v49 }
 0x133   : > { %789 = vadd.xlane.f32.xlu0 %v743_v52 }
 0x135   : > { %674 = vadd.xlane.f32.xlu1 %v2264_v15 }
 0x137   : > { %664 = vadd.xlane.f32.xlu0 %v2244_v6 }
 0x139   : > { %803 = vadd.xlane.f32.xlu1 %v750_v53 }
 0x13b   : > { %793 = vadd.xlane.f32.xlu0 %v745_v54 }
 0x13d   : > { %678 = vadd.xlane.f32.xlu1 %v2279_v22 }
 0x13f   : > { %668 = vadd.xlane.f32.xlu0 %v2255_v11 }
 0x141   : > { %807 = vadd.xlane.f32.xlu1 %v752_v55 }
 0x143   : > { %797 = vadd.xlane.f32.xlu0 %v747_v57 }
 0x145   : > { %682 = vadd.xlane.f32.xlu1 %v2290_v26 }
 0x147   : > { %672 = vadd.xlane.f32.xlu0 %v2269_v17 }
 0x149   : > { %811 = vadd.xlane.f32.xlu1 %v754_v59 }
 0x14b   : > { %801 = vadd.xlane.f32.xlu0 %v749_v60 }
 0x14d   : > { %686 = vadd.xlane.f32.xlu1 %v2299_v31 }
 0x14f   : > { %676 = vadd.xlane.f32.xlu0 %v2281_v23 }
 0x151   : > { %684 = vadd.xlane.f32.xlu1 %v2301_v32 }
 0x153   : > { %805 = vadd.xlane.f32.xlu0 %v751_v61 }
 0x155   : > { %815 = vadd.xlane.f32.xlu1 %v756_v62 }
 0x157   : > { %680 = vadd.xlane.f32.xlu0 %v2295_v29 }
 0x159   : > { %813 = vadd.xlane.f32.xlu1 %v755_v1 }
 0x15b   : > { %809 = vadd.xlane.f32.xlu0 %v753_v2 }
 0x15d   : > { %690 = vadd.xlane.f32.xlu1 %v2304_v37 }
 0x15f   : > { %640 = vadd.xlane.f32.xlu0 %v2177_v39 }
 0x161   : > { %688 = vadd.xlane.f32.xlu1 %v2309_v43 }
 0x163   : > { %642 = vadd.xlane.f32.xlu0 %v2175_v38 }
 0x165   : > { %819 = vadd.xlane.f32.xlu1 %v758_v3 }
 0x167   : > { %769 = vadd.xlane.f32.xlu0 %v733_v5 }
 0x169   : > { %817 = vadd.xlane.f32.xlu1 %v757_v7  ;;  %v2377_v7 = vld [vmem:[%s2751_s2] ss:$0 sm:$0xff] }
 0x16b   : > { %771 = vadd.xlane.f32.xlu0 %v734_v8 }
 0x16d   : > { %694 = vadd.xlane.f32.xlu1 %v2313_v47 }
 0x171   : > { %692 = vadd.xlane.f32.xlu1 %v2315_v48 }
 0x175   : > { %821 = vadd.xlane.f32.xlu1 %v759_v9 }
 0x179   : > { %823 = vadd.xlane.f32.xlu1 %v760_v12 }
 0x17c   : > { %v635_v13 = vpop.xlane.xlu0 %634 }
 0x17d   : > { %v698_v16 = vmul.f32 0.0078125, %v635_v13 }
 0x17f   : > { %v858_v19 = vmul.f32 %v698_v16, %v698_v16  ;;  %v986_v59 = vsub.f32 %v2163_v33, %v698_v16 }
 0x180   : > { %v633_v14 = vpop.xlane.xlu0 %632 }
 0x181   : > { %v697_v20 = vmul.f32 0.0078125, %v633_v14 }
 0x183   : > { %v857_v27 = vmul.f32 %v697_v20, %v697_v20  ;;  %v985_v9 = vsub.f32 %v2166_v34, %v697_v20 }
 0x184   : > { %v764_v18 = vpop.xlane.xlu0 %763 }
 0x185   : > { %v826_v21 = vmul.f32 0.0078125, %v764_v18 }
 0x187   : > { %v890_v24 = vsub.f32 %v826_v21, %v858_v19 }
 0x188   : > { %v762_v25 = vpop.xlane.xlu0 %761 }
 0x189   : > { %v922_v28 = vadd.f32 1e-05, %v890_v24  ;;  %v825_v30 = vmul.f32 0.0078125, %v762_v25  ;;  %v2388_v25 = vld [vmem:[%s2752_s3] ss:$0 sm:$0xff] }
 0x18a   : > { %v776_v40 = vpop.xlane.xlu1 %775 }
 0x18b   : > { %1872 = vrsqrt.f32 %v922_v28  ;;  %v889_v45 = vsub.f32 %v825_v30, %v857_v27 }
 0x18c   : > { %v639_v49 = vpop.xlane.xlu0 %638 }
 0x18d   : > { %v921_v52 = vadd.f32 1e-05, %v889_v45  ;;  %v700_v55 = vmul.f32 0.0078125, %v639_v49 }
 0x18e   : > { %v774_v53 = vpop.xlane.xlu1 %773 }
 0x18f   : > { %1874 = vrsqrt.f32 %v921_v52  ;;  %v860_v62 = vmul.f32 %v700_v55, %v700_v55 }
 0x190   : > { %v637_v54 = vpop.xlane.xlu0 %636 }
 0x191   : > { %v2372_v1 = vmul.f32 0.0078125, %v637_v54 }
 0x192   : > { %v651_v57 = vpop.xlane.xlu1 %650 }
 0x193   : > { %v859_v33 = vmul.f32 %v2372_v1, %v2372_v1  ;;  %v2383_v19 = vmul.f32 0.0078125, %v651_v57 }
 0x194   : > { %v768_v60 = vpop.xlane.xlu0 %767 }
 0x195   : > { %v1873_v61 = vpop.eup %1872  ;;  %v828_v2 = vmul.f32 0.0078125, %v768_v60  ;;  %v866_v49 = vmul.f32 %v2383_v19, %v2383_v19 }
 0x196   : > { %v1018_v3 = vmul.f32 %v1873_v61, %v986_v59  ;;  %v780_v5 = vpop.xlane.xlu1 %779  ;;  %v832_v59 = vmul.f32 0.0078125, %v776_v40  ;;  %v988_v40 = vsub.f32 %v2168_v35, %v700_v55 }
 0x197   : > { %v892_v8 = vsub.f32 %v828_v2, %v860_v62  ;;  %v834_v20 = vmul.f32 0.0078125, %v780_v5 }
 0x198   : > { %v766_v12 = vpop.xlane.xlu0 %765  ;;  %v1057_v18 = vmul.f32 %v2377_v7, %v1018_v3 }
 0x199   : > { %v1875_v13 = vpop.eup %1874  ;;  %v924_v14 = vadd.f32 1e-05, %v892_v8  ;;  %v827_v16 = vmul.f32 0.0078125, %v766_v12  ;;  %v898_v60 = vsub.f32 %v834_v20, %v866_v49 }
 0x19a   : > { %v655_v21 = vpop.xlane.xlu1 %654  ;;  %v1017_v24 = vmul.f32 %v1875_v13, %v985_v9  ;;  %v1096_v45 = vadd.f32 %v2388_v25, %v1057_v18  ;;  %v831_v13 = vmul.f32 0.0078125, %v774_v53 }
 0x19b   : > { %1876 = vrsqrt.f32 %v924_v14  ;;  %v891_v34 = vsub.f32 %v827_v16, %v859_v33  ;;  %v2401_v8 = vmul.f32 0.0078125, %v655_v21  ;;  %v930_v14 = vadd.f32 1e-05, %v898_v60 }
 0x19c   : > { %v647_v27 = vpop.xlane.xlu0 %646  ;;  %v1056_v28 = vmul.f32 %v2377_v7, %v1017_v24  ;;  %v1128_v5 = vmax.f32 %v1096_v45, 0.0  ;;  %v987_v45 = vsub.f32 %v2171_v36, %v2372_v1 }
 0x19d   : > { %v923_v30 = vadd.f32 1e-05, %v891_v34  ;;  %v2394_v52 = vmul.f32 0.0078125, %v647_v27  ;;  %v868_v21 = vmul.f32 %v2401_v8, %v2401_v8 }
 0x19e   : > { %v784_v54 = vpop.xlane.xlu1 %783  ;;  %v1095_v57 = vadd.f32 %v2388_v25, %v1056_v28 }
 0x19f   : > { %1878 = vrsqrt.f32 %v923_v30  ;;  %v864_v61 = vmul.f32 %v2394_v52, %v2394_v52  ;;  %v836_v18 = vmul.f32 0.0078125, %v784_v54 }
 0x1a0   : > { %v645_v62 = vpop.xlane.xlu0 %644  ;;  %v1127_v2 = vmax.f32 %v1095_v57, 0.0 }
 0x1a1   : > { %v2399_v3 = vmul.f32 0.0078125, %v645_v62  ;;  %v896_v9 = vsub.f32 %v832_v59, %v864_v61  ;;  %v900_v35 = vsub.f32 %v836_v18, %v868_v21  ;;  %v992_v18 = vsub.f32 %v2181_v41, %v2394_v52 }
 0x1a2   : > { %1736 = vmatprep.mubr.f32.mxu0 %v1127_v2  ;;  %v659_v12 = vpop.xlane.xlu1 %658 }
 0x1a3   : > { %v863_v33 = vmul.f32 %v2399_v3, %v2399_v3  ;;  %1737 = vmatmul.mubr.f32.vlgmr.msra.gmra.mrb[32].mxu0 %v1128_v5  ;;  %v928_v16 = vadd.f32 1e-05, %v896_v9  ;;  %v2415_v60 = vmul.f32 0.0078125, %v659_v12  ;;  %v932_v5 = vadd.f32 1e-05, %v900_v35 }
 0x1a4   : > { %v649_v24 = vpop.xlane.xlu0 %648 }
 0x1a5   : > { %v1877_v34 = vpop.eup %1876  ;;  %v895_v20 = vsub.f32 %v831_v13, %v863_v33  ;;  %1880 = vrsqrt.f32 %v928_v16  ;;  %v2408_v27 = vmul.f32 0.0078125, %v649_v24 }
 0x1a6   : > { %v788_v28 = vpop.xlane.xlu1 %787  ;;  %v1020_v53 = vmul.f32 %v1877_v34, %v988_v40  ;;  %1882 = vrsqrt.f32 %v930_v14  ;;  %v870_v40 = vmul.f32 %v2415_v60, %v2415_v60 }
 0x1a7   : > { %v927_v30 = vadd.f32 1e-05, %v895_v20  ;;  %v865_v54 = vmul.f32 %v2408_v27, %v2408_v27  ;;  %v838_v9 = vmul.f32 0.0078125, %v788_v28 }
 0x1a8   : > { %v778_v55 = vpop.xlane.xlu0 %777  ;;  %v1059_v59 = vmul.f32 %v2377_v7, %v1020_v53 }
 0x1a9   : > { %v1879_v49 = vpop.eup %1878  ;;  %1884 = vrsqrt.f32 %v927_v30  ;;  %v833_v57 = vmul.f32 0.0078125, %v778_v55  ;;  %v902_v34 = vsub.f32 %v838_v9, %v870_v40 }
 0x1aa   : > { %v663_v61 = vpop.xlane.xlu1 %662  ;;  %v1019_v62 = vmul.f32 %v1879_v49, %v987_v45  ;;  %v1098_v33 = vadd.f32 %v2388_v25, %v1059_v59  ;;  %v991_v49 = vsub.f32 %v2183_v42, %v2399_v3 }
 0x1ab   : > { %v897_v2 = vsub.f32 %v833_v57, %v865_v54  ;;  %v2426_v20 = vmul.f32 0.0078125, %v663_v61  ;;  %v994_v57 = vsub.f32 %v2187_v44, %v2383_v19  ;;  %v993_v19 = vsub.f32 %v2192_v46, %v2408_v27 }
 0x1ac   : > { %v653_v13 = vpop.xlane.xlu0 %652  ;;  %v1058_v36 = vmul.f32 %v2377_v7, %v1019_v62  ;;  %v1130_v35 = vmax.f32 %v1098_v33, 0.0  ;;  %v934_v62 = vadd.f32 1e-05, %v902_v34  ;;  %v996_v46 = vsub.f32 %v2200_v50, %v2401_v8 }
 0x1ad   : > { %v929_v1 = vadd.f32 1e-05, %v897_v2  ;;  %v2421_v14 = vmul.f32 0.0078125, %v653_v13  ;;  %v872_v2 = vmul.f32 %v2426_v20, %v2426_v20 }
 0x1ae   : > { %v792_v16 = vpop.xlane.xlu1 %791  ;;  %v1097_v12 = vadd.f32 %v2388_v25, %v1058_v36 }
 0x1af   : > { %1886 = vrsqrt.f32 %v929_v1  ;;  %v1881_v24 = vpop.eup %1880  ;;  %v867_v30 = vmul.f32 %v2421_v14, %v2421_v14  ;;  %v840_v54 = vmul.f32 0.0078125, %v792_v16  ;;  %v995_v8 = vsub.f32 %v2203_v51, %v2421_v14 }
 0x1b0   : > { %1888 = vrsqrt.f32 %v932_v5  ;;  %v782_v21 = vpop.xlane.xlu0 %781  ;;  %v1129_v28 = vmax.f32 %v1097_v12, 0.0  ;;  %v1024_v53 = vmul.f32 %v1881_v24, %v992_v18  ;;  %v1883_v55 = vpop.eup %1882  ;;  %v998_v51 = vsub.f32 %v2214_v56, %v2415_v60 }
 0x1b1   : > { %v835_v45 = vmul.f32 0.0078125, %v782_v21  ;;  %v1026_v36 = vmul.f32 %v1883_v55, %v994_v57  ;;  %v904_v42 = vsub.f32 %v840_v54, %v872_v2 }
 0x1b2   : > { %1739 = vmatprep.mubr.f32.mxu0 %v1129_v28  ;;  %v667_v41 = vpop.xlane.xlu1 %666  ;;  %v1063_v61 = vmul.f32 %v2377_v7, %v1024_v53 }
 0x1b3   : > { %v1885_v52 = vpop.eup %1884  ;;  %v899_v59 = vsub.f32 %v835_v45, %v867_v30  ;;  %1740 = vmatmul.mubr.f32.gmra.mrb[34].mxu0 %v1130_v35  ;;  %v1065_v34 = vmul.f32 %v2377_v7, %v1026_v36  ;;  %v936_v28 = vadd.f32 1e-05, %v904_v42  ;;  %v2447_v53 = vmul.f32 0.0078125, %v667_v41 }
 0x1b4   : > { %v657_v5 = vpop.xlane.xlu0 %656  ;;  %v1023_v9 = vmul.f32 %v1885_v52, %v991_v49  ;;  %v1102_v44 = vadd.f32 %v2388_v25, %v1063_v61 }
 0x1b5   : > { %v931_v13 = vadd.f32 1e-05, %v899_v59  ;;  %v2437_v3 = vmul.f32 0.0078125, %v657_v5  ;;  %v1104_v59 = vadd.f32 %v2388_v25, %v1065_v34  ;;  %v874_v41 = vmul.f32 %v2447_v53, %v2447_v53 }
 0x1b6   : > { %v796_v1 = vpop.xlane.xlu1 %795  ;;  %v1062_v33 = vmul.f32 %v2377_v7, %v1023_v9  ;;  %v1134_v55 = vmax.f32 %v1102_v44, 0.0 }
 0x1b7   : > { %1890 = vrsqrt.f32 %v931_v13  ;;  %v869_v18 = vmul.f32 %v2437_v3, %v2437_v3  ;;  %v842_v49 = vmul.f32 0.0078125, %v796_v1  ;;  %v1136_v44 = vmax.f32 %v1104_v59, 0.0 }
 0x1b8   : > { %1892 = vrsqrt.f32 %v934_v62  ;;  %v786_v40 = vpop.xlane.xlu0 %785  ;;  %v1101_v16 = vadd.f32 %v2388_v25, %v1062_v33  ;;  %v997_v60 = vsub.f32 %v2218_v58, %v2437_v3 }
 0x1b9   : > { %v1887_v12 = vpop.eup %1886  ;;  %v837_v24 = vmul.f32 0.0078125, %v786_v40  ;;  %1894 = vrsqrt.f32 %v936_v28  ;;  %v906_v5 = vsub.f32 %v842_v49, %v874_v41 }
 0x1ba   : > { %v1889_v21 = vpop.eup %1888  ;;  %v671_v30 = vpop.xlane.xlu1 %670  ;;  %v1133_v45 = vmax.f32 %v1101_v16, 0.0  ;;  %v1025_v35 = vmul.f32 %v1887_v12, %v993_v19 }
 0x1bb   : > { %v901_v27 = vsub.f32 %v837_v24, %v869_v18  ;;  %v1028_v61 = vmul.f32 %v1889_v21, %v996_v46  ;;  %v2460_v9 = vmul.f32 0.0078125, %v671_v30  ;;  %v938_v24 = vadd.f32 1e-05, %v906_v5 }
 0x1bc   : > { %1745 = vmatprep.mubr.f32.mxu1 %v1133_v45  ;;  %v661_v54 = vpop.xlane.xlu0 %660  ;;  %v1064_v52 = vmul.f32 %v2377_v7, %v1025_v35 }
 0x1bd   : > { %v933_v57 = vadd.f32 1e-05, %v901_v27  ;;  %1746 = vmatmul.mubr.f32.vlgmr.msra.gmra.mrb[0].mxu1 %v1134_v55  ;;  %v2455_v62 = vmul.f32 0.0078125, %v661_v54  ;;  %v1067_v19 = vmul.f32 %v2377_v7, %v1028_v61  ;;  %v876_v34 = vmul.f32 %v2460_v9, %v2460_v9 }
 0x1be   : > { %v800_v2 = vpop.xlane.xlu1 %799  ;;  %v1103_v50 = vadd.f32 %v2388_v25, %v1064_v52 }
 0x1bf   : > { %1896 = vrsqrt.f32 %v933_v57  ;;  %v871_v1 = vmul.f32 %v2455_v62, %v2455_v62  ;;  %v844_v16 = vmul.f32 0.0078125, %v800_v2  ;;  %v1106_v45 = vadd.f32 %v2388_v25, %v1067_v19 }
 0x1c0   : > { %v790_v13 = vpop.xlane.xlu0 %789  ;;  %v1135_v36 = vmax.f32 %v1103_v50, 0.0  ;;  %v1000_v50 = vsub.f32 %v2228_v63, %v2426_v20 }
 0x1c1   : > { %v1891_v42 = vpop.eup %1890  ;;  %v839_v33 = vmul.f32 0.0078125, %v790_v13  ;;  %v908_v46 = vsub.f32 %v844_v16, %v876_v34  ;;  %v1138_v41 = vmax.f32 %v1106_v45, 0.0 }
 0x1c2   : > { %v1893_v40 = vpop.eup %1892  ;;  %1748 = vmatprep.mubr.f32.mxu1 %v1135_v36  ;;  %v675_v12 = vpop.xlane.xlu1 %674  ;;  %v1027_v18 = vmul.f32 %v1891_v42, %v995_v8 }
 0x1c3   : > { %v903_v14 = vsub.f32 %v839_v33, %v871_v1  ;;  %1749 = vmatmul.mubr.f32.gmra.mrb[2].mxu1 %v1136_v44  ;;  %v1030_v35 = vmul.f32 %v1893_v40, %v998_v51  ;;  %v1895_v56 = vpop.eup %1894  ;;  %v940_v8 = vadd.f32 1e-05, %v908_v46  ;;  %v2481_v5 = vmul.f32 0.0078125, %v675_v12 }
 0x1c4   : > { %v665_v21 = vpop.xlane.xlu0 %664  ;;  %v1066_v28 = vmul.f32 %v2377_v7, %v1027_v18  ;;  %v1032_v33 = vmul.f32 %v1895_v56, %v1000_v50  ;;  %v999_v18 = vsub.f32 %v2230_v0, %v2455_v62  ;;  %v1002_v56 = vsub.f32 %v2239_v4, %v2447_v53 }
 0x1c5   : > { %v935_v30 = vadd.f32 1e-05, %v903_v14  ;;  %v2471_v27 = vmul.f32 0.0078125, %v665_v21  ;;  %v1069_v2 = vmul.f32 %v2377_v7, %v1030_v35  ;;  %v878_v63 = vmul.f32 %v2481_v5, %v2481_v5 }
 0x1c6   : > { %v804_v55 = vpop.xlane.xlu1 %803  ;;  %v1105_v49 = vadd.f32 %v2388_v25, %v1066_v28  ;;  %v1071_v34 = vmul.f32 %v2377_v7, %v1032_v33 }
 0x1c7   : > { %1898 = vrsqrt.f32 %v935_v30  ;;  %v873_v59 = vmul.f32 %v2471_v27, %v2471_v27  ;;  %v846_v36 = vmul.f32 0.0078125, %v804_v55  ;;  %v1108_v19 = vadd.f32 %v2388_v25, %v1069_v2 }
 0x1c8   : > { %1900 = vrsqrt.f32 %v938_v24  ;;  %v794_v54 = vpop.xlane.xlu0 %793  ;;  %v1137_v52 = vmax.f32 %v1105_v49, 0.0  ;;  %v1001_v4 = vsub.f32 %v2244_v6, %v2471_v27 }
 0x1c9   : > { %v1897_v57 = vpop.eup %1896  ;;  %v841_v61 = vmul.f32 0.0078125, %v794_v54  ;;  %1902 = vrsqrt.f32 %v940_v8  ;;  %v910_v51 = vsub.f32 %v846_v36, %v878_v63  ;;  %v1140_v35 = vmax.f32 %v1108_v19, 0.0 }
 0x1ca   : > { %1751 = vmatprep.mubr.f32.mxu1 %v1137_v52  ;;  %v679_v13 = vpop.xlane.xlu1 %678  ;;  %v1029_v58 = vmul.f32 %v1897_v57, %v997_v60  ;;  %v1110_v57 = vadd.f32 %v2388_v25, %v1071_v34  ;;  %v1004_v63 = vsub.f32 %v2252_v10, %v2460_v9 }
 0x1cb   : > { %v905_v3 = vsub.f32 %v841_v61, %v873_v59  ;;  %1752 = vmatmul.mubr.f32.gmra.mrb[4].mxu1 %v1138_v41  ;;  %v2490_v12 = vmul.f32 0.0078125, %v679_v13  ;;  %v942_v60 = vadd.f32 1e-05, %v910_v51 }
 0x1cc   : > { %v669_v42 = vpop.xlane.xlu0 %668  ;;  %v1068_v1 = vmul.f32 %v2377_v7, %v1029_v58  ;;  %v1142_v36 = vmax.f32 %v1110_v57, 0.0 }
 0x1cd   : > { %v937_v44 = vadd.f32 1e-05, %v905_v3  ;;  %v2487_v20 = vmul.f32 0.0078125, %v669_v42  ;;  %v880_v0 = vmul.f32 %v2490_v12, %v2490_v12 }
 0x1ce   : > { %v808_v40 = vpop.xlane.xlu1 %807  ;;  %v1107_v16 = vadd.f32 %v2388_v25, %v1068_v1 }
 0x1cf   : > { %1904 = vrsqrt.f32 %v937_v44  ;;  %v875_v28 = vmul.f32 %v2487_v20, %v2487_v20  ;;  %v848_v30 = vmul.f32 0.0078125, %v808_v40 }
 0x1d0   : > { %v798_v14 = vpop.xlane.xlu0 %797  ;;  %v1139_v24 = vmax.f32 %v1107_v16, 0.0 }
 0x1d1   : > { %v1899_v21 = vpop.eup %1898  ;;  %v843_v45 = vmul.f32 0.0078125, %v798_v14  ;;  %v912_v59 = vsub.f32 %v848_v30, %v880_v0 }
 0x1d2   : > { %v1901_v46 = vpop.eup %1900  ;;  %1754 = vmatprep.mubr.f32.mxu1 %v1139_v24  ;;  %v683_v55 = vpop.xlane.xlu1 %682  ;;  %v1031_v49 = vmul.f32 %v1899_v21, %v999_v18 }
 0x1d3   : > { %v907_v62 = vsub.f32 %v843_v45, %v875_v28  ;;  %1755 = vmatmul.mubr.f32.gmra.mrb[6].mxu1 %v1140_v35  ;;  %v1034_v41 = vmul.f32 %v1901_v46, %v1002_v56  ;;  %v1903_v53 = vpop.eup %1902  ;;  %v2508_v13 = vmul.f32 0.0078125, %v683_v55  ;;  %v944_v1 = vadd.f32 1e-05, %v912_v59 }
 0x1d4   : > { %v673_v54 = vpop.xlane.xlu0 %672  ;;  %v1070_v52 = vmul.f32 %v2377_v7, %v1031_v49  ;;  %v1036_v24 = vmul.f32 %v1903_v53, %v1004_v63  ;;  %v1003_v35 = vsub.f32 %v2255_v11, %v2487_v20 }
 0x1d5   : > { %v939_v61 = vadd.f32 1e-05, %v907_v62  ;;  %v2503_v2 = vmul.f32 0.0078125, %v673_v54  ;;  %v1073_v19 = vmul.f32 %v2377_v7, %v1034_v41  ;;  %v882_v18 = vmul.f32 %v2508_v13, %v2508_v13 }
 0x1d6   : > { %v812_v50 = vpop.xlane.xlu1 %811  ;;  %v1109_v8 = vadd.f32 %v2388_v25, %v1070_v52  ;;  %v1075_v49 = vmul.f32 %v2377_v7, %v1036_v24 }
 0x1d7   : > { %1906 = vrsqrt.f32 %v939_v61  ;;  %v877_v33 = vmul.f32 %v2503_v2, %v2503_v2  ;;  %v850_v6 = vmul.f32 0.0078125, %v812_v50  ;;  %v1112_v21 = vadd.f32 %v2388_v25, %v1073_v19 }
 0x1d8   : > { %1908 = vrsqrt.f32 %v942_v60  ;;  %v802_v58 = vpop.xlane.xlu0 %801  ;;  %v1141_v3 = vmax.f32 %v1109_v8, 0.0  ;;  %v1006_v61 = vsub.f32 %v2264_v15, %v2481_v5  ;;  %v1114_v53 = vadd.f32 %v2388_v25, %v1075_v49 }
 0x1d9   : > { %v1905_v42 = vpop.eup %1904  ;;  %v845_v44 = vmul.f32 0.0078125, %v802_v58  ;;  %1910 = vrsqrt.f32 %v944_v1  ;;  %v914_v28 = vsub.f32 %v850_v6, %v882_v18  ;;  %v1144_v60 = vmax.f32 %v1112_v21, 0.0 }
 0x1da   : > { %1757 = vmatprep.mubr.f32.mxu1 %v1141_v3  ;;  %v687_v27 = vpop.xlane.xlu1 %686  ;;  %v1033_v40 = vmul.f32 %v1905_v42, %v1001_v4  ;;  %v1005_v19 = vsub.f32 %v2269_v17, %v2503_v2 }
 0x1db   : > { %v909_v16 = vsub.f32 %v845_v44, %v877_v33  ;;  %1758 = vmatmul.mubr.f32.gmra.mrb[8].mxu1 %v1142_v36  ;;  %v2522_v45 = vmul.f32 0.0078125, %v687_v27  ;;  %v946_v52 = vadd.f32 1e-05, %v914_v28  ;;  %v1008_v33 = vsub.f32 %v2279_v22, %v2490_v12 }
 0x1dc   : > { %v677_v51 = vpop.xlane.xlu0 %676  ;;  %v1072_v14 = vmul.f32 %v2377_v7, %v1033_v40 }
 0x1dd   : > { %v941_v34 = vadd.f32 1e-05, %v909_v16  ;;  %v2519_v30 = vmul.f32 0.0078125, %v677_v51  ;;  %v884_v11 = vmul.f32 %v2522_v45, %v2522_v45 }
 0x1de   : > { %v685_v10 = vpop.xlane.xlu1 %684  ;;  %v1111_v9 = vadd.f32 %v2388_v25, %v1072_v14  ;;  %v1146_v14 = vmax.f32 %v1114_v53, 0.0 }
 0x1df   : > { %1912 = vrsqrt.f32 %v941_v34  ;;  %v879_v0 = vmul.f32 %v2519_v30, %v2519_v30  ;;  %v2533_v50 = vmul.f32 0.0078125, %v685_v10 }
 0x1e0   : > { %v806_v46 = vpop.xlane.xlu0 %805  ;;  %v1143_v55 = vmax.f32 %v1111_v9, 0.0  ;;  %1914 = vrsqrt.f32 %v946_v52 }
 0x1e1   : > { %v1907_v56 = vpop.eup %1906  ;;  %v847_v62 = vmul.f32 0.0078125, %v806_v46  ;;  %v883_v63 = vmul.f32 %v2533_v50, %v2533_v50 }
 0x1e2   : > { %v1909_v54 = vpop.eup %1908  ;;  %1760 = vmatprep.mubr.f32.mxu1 %v1143_v55  ;;  %v816_v57 = vpop.xlane.xlu1 %815  ;;  %v1035_v59 = vmul.f32 %v1907_v56, %v1003_v35 }
 0x1e3   : > { %v911_v20 = vsub.f32 %v847_v62, %v879_v0  ;;  %v852_v41 = vmul.f32 0.0078125, %v816_v57  ;;  %1761 = vmatmul.mubr.f32.gmra.mrb[10].mxu1 %v1144_v60  ;;  %v1038_v42 = vmul.f32 %v1909_v54, %v1006_v61  ;;  %v1911_v1 = vpop.eup %1910  ;;  %v1007_v62 = vsub.f32 %v2281_v23, %v2519_v30 }
 0x1e4   : > { %v681_v8 = vpop.xlane.xlu0 %680  ;;  %v1074_v4 = vmul.f32 %v2377_v7, %v1035_v59  ;;  %v1040_v21 = vmul.f32 %v1911_v1, %v1008_v33  ;;  %v1010_v61 = vsub.f32 %v2290_v26, %v2508_v13  ;;  %v1012_v26 = vsub.f32 %v2299_v31, %v2522_v45 }
 0x1e5   : > { %v943_v58 = vadd.f32 1e-05, %v911_v20  ;;  %v916_v3 = vsub.f32 %v852_v41, %v884_v11  ;;  %v2537_v36 = vmul.f32 0.0078125, %v681_v8  ;;  %v1077_v24 = vmul.f32 %v2377_v7, %v1038_v42 }
 0x1e6   : > { %v814_v15 = vpop.xlane.xlu1 %813  ;;  %v1113_v5 = vadd.f32 %v2388_v25, %v1074_v4  ;;  %v1079_v49 = vmul.f32 %v2377_v7, %v1040_v21  ;;  %v1011_v1 = vsub.f32 %v2301_v32, %v2533_v50 }
 0x1e7   : > { %1916 = vrsqrt.f32 %v943_v58  ;;  %v948_v44 = vadd.f32 1e-05, %v916_v3  ;;  %v851_v6 = vmul.f32 0.0078125, %v814_v15  ;;  %v881_v18 = vmul.f32 %v2537_v36, %v2537_v36 }
 0x1e8   : > { %v810_v27 = vpop.xlane.xlu0 %809  ;;  %v1145_v40 = vmax.f32 %v1113_v5, 0.0  ;;  %v1116_v35 = vadd.f32 %v2388_v25, %v1077_v24  ;;  %v1118_v41 = vadd.f32 %v2388_v25, %v1079_v49  ;;  %v1009_v33 = vsub.f32 %v2295_v29, %v2537_v36 }
 0x1e9   : > { %v1913_v16 = vpop.eup %1912  ;;  %v849_v51 = vmul.f32 0.0078125, %v810_v27  ;;  %v915_v22 = vsub.f32 %v851_v6, %v883_v63  ;;  %1918 = vrsqrt.f32 %v948_v44 }
 0x1ea   : > { %1763 = vmatprep.mubr.f32.mxu1 %v1145_v40  ;;  %v691_v12 = vpop.xlane.xlu1 %690  ;;  %v1037_v34 = vmul.f32 %v1913_v16, %v1005_v19  ;;  %v1915_v0 = vpop.eup %1914  ;;  %v1148_v59 = vmax.f32 %v1116_v35, 0.0  ;;  %v1150_v63 = vmax.f32 %v1118_v41, 0.0 }
 0x1eb   : > { %v913_v17 = vsub.f32 %v849_v51, %v881_v18  ;;  %1764 = vmatmul.mubr.f32.gmra.mrb[12].mxu1 %v1146_v14  ;;  %v947_v2 = vadd.f32 1e-05, %v915_v22  ;;  %v2553_v56 = vmul.f32 0.0078125, %v691_v12  ;;  %v1042_v3 = vmul.f32 %v1915_v0, %v1010_v61 }
 0x1ec   : > { %v641_v28 = vpop.xlane.xlu0 %640  ;;  %v1076_v10 = vmul.f32 %v2377_v7, %v1037_v34 }
 0x1ed   : > { %v945_v9 = vadd.f32 1e-05, %v913_v17  ;;  %1920 = vrsqrt.f32 %v947_v2  ;;  %v2557_v57 = vmul.f32 0.0078125, %v641_v28  ;;  %v886_v8 = vmul.f32 %v2553_v56, %v2553_v56 }
 0x1ee   : > { %v689_v46 = vpop.xlane.xlu1 %688  ;;  %v1115_v55 = vadd.f32 %v2388_v25, %v1076_v10  ;;  %v1081_v32 = vmul.f32 %v2377_v7, %v1042_v3 }
 0x1ef   : > { %1922 = vrsqrt.f32 %v945_v9  ;;  %v2564_v4 = vmul.f32 0.0078125, %v689_v46  ;;  %v861_v13 = vmul.f32 %v2557_v57, %v2557_v57 }
 0x1f0   : > { %v643_v60 = vpop.xlane.xlu0 %642  ;;  %v1147_v54 = vmax.f32 %v1115_v55, 0.0  ;;  %v1120_v9 = vadd.f32 %v2388_v25, %v1081_v32 }
 0x1f1   : > { %v1917_v52 = vpop.eup %1916  ;;  %v2566_v30 = vmul.f32 0.0078125, %v643_v60  ;;  %v885_v6 = vmul.f32 %v2564_v4, %v2564_v4 }
 0x1f2   : > { %1766 = vmatprep.mubr.f32.mxu1 %v1147_v54  ;;  %v820_v11 = vpop.xlane.xlu1 %819  ;;  %v1039_v20 = vmul.f32 %v1917_v52, %v1007_v62  ;;  %v1152_v60 = vmax.f32 %v1120_v9, 0.0  ;;  %v1014_v52 = vsub.f32 %v2304_v37, %v2553_v56 }
 0x1f3   : > { %v854_v23 = vmul.f32 0.0078125, %v820_v11  ;;  %1767 = vmatmul.mubr.f32.gmra.mrb[14].mxu1 %v1148_v59  ;;  %v1919_v42 = vpop.eup %1918  ;;  %v862_v16 = vmul.f32 %v2566_v30, %v2566_v30 }
 0x1f4   : > { %v770_v53 = vpop.xlane.xlu0 %769  ;;  %v1078_v58 = vmul.f32 %v2377_v7, %v1039_v20  ;;  %v1044_v50 = vmul.f32 %v1919_v42, %v1012_v26  ;;  %v1013_v26 = vsub.f32 %v2309_v43, %v2564_v4 }
 0x1f5   : > { %v918_v15 = vsub.f32 %v854_v23, %v886_v8  ;;  %v829_v5 = vmul.f32 0.0078125, %v770_v53  ;;  %v989_v23 = vsub.f32 %v2177_v39, %v2557_v57  ;;  %v990_v39 = vsub.f32 %v2175_v38, %v2566_v30 }
 0x1f6   : > { %v818_v44 = vpop.xlane.xlu1 %817  ;;  %v1117_v19 = vadd.f32 %v2388_v25, %v1078_v58  ;;  %v1083_v35 = vmul.f32 %v2377_v7, %v1044_v50 }
 0x1f7   : > { %v950_v31 = vadd.f32 1e-05, %v918_v15  ;;  %v893_v45 = vsub.f32 %v829_v5, %v861_v13  ;;  %v853_v27 = vmul.f32 0.0078125, %v818_v44  ;;  %v1921_v40 = vpop.eup %1920 }
 0x1f8   : > { %v772_v18 = vpop.xlane.xlu0 %771  ;;  %v1149_v51 = vmax.f32 %v1117_v19, 0.0  ;;  %v1043_v34 = vmul.f32 %v1921_v40, %v1011_v1  ;;  %v1122_v54 = vadd.f32 %v2388_v25, %v1083_v35 }
 0x1f9   : > { %v1923_v29 = vpop.eup %1922  ;;  %1924 = vrsqrt.f32 %v950_v31  ;;  %v925_v36 = vadd.f32 1e-05, %v893_v45  ;;  %v917_v14 = vsub.f32 %v853_v27, %v885_v6  ;;  %v830_v24 = vmul.f32 0.0078125, %v772_v18 }
 0x1fa   : > { %1769 = vmatprep.mubr.f32.mxu1 %v1149_v51  ;;  %v695_v22 = vpop.xlane.xlu1 %694  ;;  %v1041_v12 = vmul.f32 %v1923_v29, %v1009_v33  ;;  %v1082_v28 = vmul.f32 %v2377_v7, %v1043_v34  ;;  %v1154_v42 = vmax.f32 %v1122_v54, 0.0 }
 0x1fb   : > { %1926 = vrsqrt.f32 %v925_v36  ;;  %v949_v21 = vadd.f32 1e-05, %v917_v14  ;;  %v894_v17 = vsub.f32 %v830_v24, %v862_v16  ;;  %1770 = vmatmul.mubr.f32.gmra.mrb[16].mxu1 %v1150_v63  ;;  %v728_v20 = vmul.f32 0.0078125, %v695_v22 }
 0x1fc   : > { %v1080_v2 = vmul.f32 %v2377_v7, %v1041_v12  ;;  %v1121_v49 = vadd.f32 %v2388_v25, %v1082_v28 }
 0x1fd   : > { %1928 = vrsqrt.f32 %v949_v21  ;;  %v926_v10 = vadd.f32 1e-05, %v894_v17  ;;  %v888_v15 = vmul.f32 %v728_v20, %v728_v20  ;;  %v1016_v36 = vsub.f32 %v2313_v47, %v728_v20  ;;  %v2618_v47 = vld [vmem:[%s2754_s5] ss:$0 sm:$0xff] }
 0x1fe   : > { %v693_v46 = vpop.xlane.xlu1 %692  ;;  %v1119_v55 = vadd.f32 %v2388_v25, %v1080_v2  ;;  %v1153_v61 = vmax.f32 %v1121_v49, 0.0 }
 0x1ff   : > { %1930 = vrsqrt.f32 %v926_v10  ;;  %v727_v0 = vmul.f32 0.0078125, %v693_v46 }
 0x200   : > { %v1151_v62 = vmax.f32 %v1119_v55, 0.0 }
 0x201   : > { %v887_v41 = vmul.f32 %v727_v0, %v727_v0  ;;  %v1015_v32 = vsub.f32 %v2315_v48, %v727_v0 }
 0x202   : > { %1772 = vmatprep.mubr.f32.mxu1 %v1151_v62  ;;  %v822_v59 = vpop.xlane.xlu1 %821 }
 0x203   : > { %v1925_v11 = vpop.eup %1924  ;;  %v855_v8 = vmul.f32 0.0078125, %v822_v59  ;;  %1773 = vmatmul.mubr.f32.gmra.mrb[18].mxu1 %v1152_v60 }
 0x204   : > { %1775 = vmatprep.mubr.f32.mxu1 %v1153_v61  ;;  %v1046_v53 = vmul.f32 %v1925_v11, %v1014_v52 }
 0x205   : > { %v1927_v58 = vpop.eup %1926  ;;  %v919_v3 = vsub.f32 %v855_v8, %v887_v41 }
 0x206   : > { %v824_v37 = vpop.xlane.xlu1 %823  ;;  %v1021_v56 = vmul.f32 %v1927_v58, %v989_v23  ;;  %v1085_v33 = vmul.f32 %v2377_v7, %v1046_v53 }
 0x207   : > { %v1929_v13 = vpop.eup %1928  ;;  %v951_v5 = vadd.f32 1e-05, %v919_v3  ;;  %v856_v1 = vmul.f32 0.0078125, %v824_v37  ;;  %1776 = vmatmul.mubr.f32.gmra.mrb[20].mxu1 %v1154_v42 }
 0x208   : > { %v1060_v57 = vmul.f32 %v2377_v7, %v1021_v56  ;;  %v1045_v44 = vmul.f32 %v1929_v13, %v1013_v26  ;;  %v1124_v45 = vadd.f32 %v2388_v25, %v1085_v33 }
 0x209   : > { %v1931_v19 = vpop.eup %1930  ;;  %1932 = vrsqrt.f32 %v951_v5  ;;  %v920_v63 = vsub.f32 %v856_v1, %v888_v15 }
 0x20a   : > { %v1099_v43 = vadd.f32 %v2388_v25, %v1060_v57  ;;  %v1084_v4 = vmul.f32 %v2377_v7, %v1045_v44  ;;  %v1022_v6 = vmul.f32 %v1931_v19, %v990_v39  ;;  %v1156_v18 = vmax.f32 %v1124_v45, 0.0 }
 0x20b   : > { %v952_v31 = vadd.f32 1e-05, %v920_v63 }
 0x20c   : > { %v1131_v27 = vmax.f32 %v1099_v43, 0.0  ;;  %v1123_v40 = vadd.f32 %v2388_v25, %v1084_v4  ;;  %v1061_v16 = vmul.f32 %v2377_v7, %v1022_v6 }
 0x20d   : > { %1934 = vrsqrt.f32 %v952_v31 }
 0x20e   : > { %1742 = vmatprep.mubr.f32.mxu0 %v1131_v27  ;;  %v1155_v38 = vmax.f32 %v1123_v40, 0.0  ;;  %v1100_v30 = vadd.f32 %v2388_v25, %v1061_v16 }
 0x210   : > { %1778 = vmatprep.mubr.f32.mxu1 %v1155_v38  ;;  %v1132_v51 = vmax.f32 %v1100_v30, 0.0 }
 0x211   : > { %1779 = vmatmul.mubr.f32.gmra.mrb[22].mxu1 %v1156_v18 }
 0x212   : > { %1743 = vmatmul.mubr.f32.gmra.mrb[36].mxu0 %v1132_v51 }
 0x213   : > { %v1933_v50 = vpop.eup %1932 }
 0x214   : > { %v1047_v29 = vmul.f32 %v1933_v50, %v1015_v32 }
 0x216   : > { %v1086_v14 = vmul.f32 %v2377_v7, %v1047_v29 }
 0x217   : > { %v1935_v24 = vpop.eup %1934 }
 0x218   : > { %v1125_v22 = vadd.f32 %v2388_v25, %v1086_v14  ;;  %v1048_v12 = vmul.f32 %v1935_v24, %v1016_v36 }
 0x21a   : > { %v1157_v34 = vmax.f32 %v1125_v22, 0.0  ;;  %v1087_v21 = vmul.f32 %v2377_v7, %v1048_v12 }
 0x21c   : > { %1781 = vmatprep.mubr.f32.mxu1 %v1157_v34  ;;  %v1126_v17 = vadd.f32 %v2388_v25, %v1087_v21 }
 0x21e   : > { %v1158_v2 = vmax.f32 %v1126_v17, 0.0 }
 0x220   : > { %1782 = vmatmul.mubr.f32.gmra.mrb[24].mxu1 %v1158_v2 }
 0x276   : > { %v1738_v48 = vpop.f32.mrb[32].mxu0 }
 0x277   : > { %v1254_v28 = vadd.f32 %v1738_v48, %v2618_v47  ;;  %v1248_v10 = vpop.f32.mrb[33].mxu0 }
 0x278   : > { %v1249_v9 = vadd.f32 %v2618_v47, %v1248_v10 }
 0x279   : > { %1408 = vst [vmem:[%s2622_s15 + $0x8] sm:$0xff] %v1254_v28 }
 0x27a   : > { %1407 = vst [vmem:[%s2622_s15] sm:$0xff] %v1249_v9 }
 0x286   : > { %v1741_v7 = vpop.f32.mrb[34].mxu0 }
 0x287   : > { %v1264_v25 = vadd.f32 %v1741_v7, %v2618_v47  ;;  %v1258_v35 = vpop.f32.mrb[35].mxu0 }
 0x288   : > { %v1259_v46 = vadd.f32 %v2618_v47, %v1258_v35 }
 0x289   : > { %1410 = vst [vmem:[%s2622_s15 + $0x18] sm:$0xff] %v1264_v25 }
 0x28a   : > { %1409 = vst [vmem:[%s2622_s15 + $0x10] sm:$0xff] %v1259_v46 }
 0x290   : > { %v1747_v55 = vpop.f32.mrb[0].mxu1 }
 0x291   : > { %v1284_v49 = vadd.f32 %v1747_v55, %v2618_v47  ;;  %v1278_v0 = vpop.f32.mrb[1].mxu1 }
 0x292   : > { %v1279_v62 = vadd.f32 %v2618_v47, %v1278_v0 }
 0x293   : > { %1414 = vst [vmem:[%s2622_s15 + $0x38] sm:$0xff] %v1284_v49 }
 0x294   : > { %1413 = vst [vmem:[%s2622_s15 + $0x30] sm:$0xff] %v1279_v62 }
 0x296   : > { %v1750_v60 = vpop.f32.mrb[2].mxu1 }
 0x297   : > { %v1294_v54 = vadd.f32 %v1750_v60, %v2618_v47  ;;  %v1288_v52 = vpop.f32.mrb[3].mxu1 }
 0x298   : > { %v1289_v59 = vadd.f32 %v2618_v47, %v1288_v52 }
 0x299   : > { %1416 = vst [vmem:[%s2622_s15 + $0x48] sm:$0xff] %v1294_v54 }
 0x29a   : > { %1415 = vst [vmem:[%s2622_s15 + $0x40] sm:$0xff] %v1289_v59 }
 0x29e   : > { %v1753_v61 = vpop.f32.mrb[4].mxu1 }
 0x29f   : > { %v1304_v11 = vadd.f32 %v1753_v61, %v2618_v47  ;;  %v1298_v20 = vpop.f32.mrb[5].mxu1 }
 0x2a0   : > { %v1299_v41 = vadd.f32 %v2618_v47, %v1298_v20 }
 0x2a1   : > { %1418 = vst [vmem:[%s2622_s15 + $0x58] sm:$0xff] %v1304_v11 }
 0x2a2   : > { %1417 = vst [vmem:[%s2622_s15 + $0x50] sm:$0xff] %v1299_v41 }
 0x2a6   : > { %v1756_v8 = vpop.f32.mrb[6].mxu1 }
 0x2a7   : > { %v1314_v23 = vadd.f32 %v1756_v8, %v2618_v47  ;;  %v1308_v53 = vpop.f32.mrb[7].mxu1 }
 0x2a8   : > { %v1309_v58 = vadd.f32 %v2618_v47, %v1308_v53 }
 0x2a9   : > { %1420 = vst [vmem:[%s2622_s15 + $0x68] sm:$0xff] %v1314_v23 }
 0x2aa   : > { %1419 = vst [vmem:[%s2622_s15 + $0x60] sm:$0xff] %v1309_v58 }
 0x2ae   : > { %v1759_v3 = vpop.f32.mrb[8].mxu1 }
 0x2af   : > { %v1324_v42 = vadd.f32 %v1759_v3, %v2618_v47  ;;  %v1318_v26 = vpop.f32.mrb[9].mxu1 }
 0x2b0   : > { %v1319_v37 = vadd.f32 %v2618_v47, %v1318_v26 }
 0x2b1   : > { %1422 = vst [vmem:[%s2622_s15 + $0x78] sm:$0xff] %v1324_v42 }
 0x2b2   : > { %1421 = vst [vmem:[%s2622_s15 + $0x70] sm:$0xff] %v1319_v37 }
 0x2b6   : > { %v1762_v56 = vpop.f32.mrb[10].mxu1 }
 0x2b7   : > { %v1334_v13 = vadd.f32 %v1762_v56, %v2618_v47  ;;  %v1328_v15 = vpop.f32.mrb[11].mxu1 }
 0x2b8   : > { %v1329_v5 = vadd.f32 %v2618_v47, %v1328_v15 }
 0x2b9   : > { %1424 = vst [vmem:[%s2622_s15 + $0x88] sm:$0xff] %v1334_v13 }
 0x2ba   : > { %1423 = vst [vmem:[%s2622_s15 + $0x80] sm:$0xff] %v1329_v5 }
 0x2be   : > { %v1765_v1 = vpop.f32.mrb[12].mxu1 }
 0x2bf   : > { %v1344_v33 = vadd.f32 %v1765_v1, %v2618_v47  ;;  %v1338_v39 = vpop.f32.mrb[13].mxu1 }
 0x2c0   : > { %v1339_v57 = vadd.f32 %v2618_v47, %v1338_v39 }
 0x2c1   : > { %1426 = vst [vmem:[%s2622_s15 + $0x98] sm:$0xff] %v1344_v33 }
 0x2c2   : > { %1425 = vst [vmem:[%s2622_s15 + $0x90] sm:$0xff] %v1339_v57 }
 0x2c6   : > { %v1768_v44 = vpop.f32.mrb[14].mxu1 }
 0x2c7   : > { %v1354_v19 = vadd.f32 %v1768_v44, %v2618_v47  ;;  %v1348_v63 = vpop.f32.mrb[15].mxu1 }
 0x2c8   : > { %v1349_v43 = vadd.f32 %v2618_v47, %v1348_v63 }
 0x2c9   : > { %1428 = vst [vmem:[%s2622_s15 + $0xa8] sm:$0xff] %v1354_v19 }
 0x2ca   : > { %1427 = vst [vmem:[%s2622_s15 + $0xa0] sm:$0xff] %v1349_v43 }
 0x2ce   : > { %v1771_v4 = vpop.f32.mrb[16].mxu1 }
 0x2cf   : > { %v1364_v6 = vadd.f32 %v1771_v4, %v2618_v47  ;;  %v1358_v31 = vpop.f32.mrb[17].mxu1 }
 0x2d0   : > { %v1359_v45 = vadd.f32 %v2618_v47, %v1358_v31 }
 0x2d1   : > { %1430 = vst [vmem:[%s2622_s15 + $0xb8] sm:$0xff] %v1364_v6 }
 0x2d2   : > { %1429 = vst [vmem:[%s2622_s15 + $0xb0] sm:$0xff] %v1359_v45 }
 0x2d6   : > { %v1774_v27 = vpop.f32.mrb[18].mxu1 }
 0x2d7   : > { %v1374_v40 = vadd.f32 %v1774_v27, %v2618_v47  ;;  %v1368_v16 = vpop.f32.mrb[19].mxu1 }
 0x2d8   : > { %v1369_v38 = vadd.f32 %v2618_v47, %v1368_v16 }
 0x2d9   : > { %1432 = vst [vmem:[%s2622_s15 + $0xc8] sm:$0xff] %v1374_v40 }
 0x2da   : > { %1431 = vst [vmem:[%s2622_s15 + $0xc0] sm:$0xff] %v1369_v38  ;;  %v1777_v30 = vpop.f32.mrb[20].mxu1 }
 0x2db   : > { %v1384_v18 = vadd.f32 %v1777_v30, %v2618_v47  ;;  %v1378_v51 = vpop.f32.mrb[21].mxu1 }
 0x2dc   : > { %v1379_v32 = vadd.f32 %v2618_v47, %v1378_v51 }
 0x2dd   : > { %1434 = vst [vmem:[%s2622_s15 + $0xd8] sm:$0xff] %v1384_v18 }
 0x2de   : > { %1433 = vst [vmem:[%s2622_s15 + $0xd0] sm:$0xff] %v1379_v32 }
 0x2e4   : > { %v1780_v50 = vpop.f32.mrb[22].mxu1 }
 0x2e5   : > { %v1394_v29 = vadd.f32 %v1780_v50, %v2618_v47  ;;  %v1744_v36 = vpop.f32.mrb[36].mxu0  ;;  %v1388_v14 = vpop.f32.mrb[23].mxu1 }
 0x2e6   : > { %v1274_v24 = vadd.f32 %v1744_v36, %v2618_v47  ;;  %v1389_v22 = vadd.f32 %v2618_v47, %v1388_v14  ;;  %v1268_v12 = vpop.f32.mrb[37].mxu0 }
 0x2e7   : > { %1436 = vst [vmem:[%s2622_s15 + $0xe8] sm:$0xff] %v1394_v29  ;;  %v1269_v34 = vadd.f32 %v2618_v47, %v1268_v12 }
 0x2e8   : > { %1412 = vst [vmem:[%s2622_s15 + $0x28] sm:$0xff] %v1274_v24  ;;  %1435 = vst [vmem:[%s2622_s15 + $0xe0] sm:$0xff] %v1389_v22 }
 0x2e9   : > { %1411 = vst [vmem:[%s2622_s15 + $0x20] sm:$0xff] %v1269_v34 }
 0x2f1   : > { %1446 = sbr.rel (!%p2076_p5) target bundleno = 788 (0x314), region = 48 }
 0x2f3   : > { %v1783_v21 = vpop.f32.mrb[24].mxu1 }
 0x2f4   : > { %v1404_v17 = vadd.f32 %v1783_v21, %v2618_v47  ;;  %v1398_v2 = vpop.f32.mrb[25].mxu1 }
 0x2f5   : > { %v1399_v48 = vadd.f32 %v2618_v47, %v1398_v2 }
 0x2f6   : > { %1438 = vst [vmem:[%s2622_s15 + $0xf8] sm:$0xff] %v1404_v17 }
 0x2f7   : > { %1437 = vst [vmem:[%s2622_s15 + $0xf0] sm:$0xff] %v1399_v48 }
 0x2f8   : > { %s2763_s17 = smov (!%p1449_p11, %s1448_s17), 32 }
 0x2f9   : > { %s2693_s18 = sshll.u32 %s2763_s17, 7 }
 0x2fa   : > { %s1453_s19 = ssub.s32 4096, %s2693_s18 }
 0x2fb   : > { %1454 = vsyncadd %s2688_s16, %s1453_s19  ;;  %p1566_p12 = scmp.ne.s32.totalorder %s2693_s18, 0  ;;  %s1572_s20 = sshll.u32 %s2059_s25, 12 }
 0x2fc   : > { %s2702_s28 = scalar_lea.hbm %s2755_s6, %s1572_s20  ;;  %s1459_s11 = sshll.u32 %s2622_s15, 4  ;;  %s2705_s11 = int_to_ptr.vmem [resolvable:$true] %s1459_s11 }
 0x2fd   : > { %s1936_s29 = scalar_lea.vmem %s2705_s11, %s2693_s18  ;;  %s2000_s9 = smov [#allocation2]  }
 0x2fe   : > { %p1937_p13 = scmp.ne.s32.totalorder %s2705_s11, %s1936_s29  ;;  %s1940_s10 = sshll.u32 %s2000_s9, 4  ;;  %s1941_s10 = int_to_ptr.vmem [resolvable:$false] %s1940_s10 }
 0x2ff   : > { %s1942_s25 = scalar_lea.vmem %s1941_s10, 8192  ;;  %p1943_p2 = scmp.lt.s32.totalorder %s2705_s11, %s1941_s10 }
 0x300   : > { %p1938_p0 = pnand %p1937_p13, %p1566_p12  ;;  %p1944_p3 = scmp.lt.s32.totalorder %s1942_s25, %s1936_s29 }
 0x302   : > { %p1939_p1 = pneg %p1938_p0  ;;  %p1945_p4 = por %p1944_p3, %p1943_p2 }
 0x304   : > { %p1946_p5 = pnand %p1945_p4, %p1939_p1 }
 0x306   : > { %1949 = shalt.err (!%p1946_p5)
}
 0x307   : > { %s1950_s12 = scalar_lea.hbm %s2702_s28, %s2693_s18  ;;  %s1954_s15 = scalar_lea.hbm %s2755_s6, 4864 }
 0x308   : > { %p1951_p7 = scmp.ne.s32.totalorder %s2702_s28, %s1950_s12  ;;  %p1955_p10 = scmp.lt.u32.totalorder %s2702_s28, %s2755_s6 }
 0x309   : > { %p1956_p11 = scmp.lt.u32.totalorder %s1954_s15, %s1950_s12  ;;  %p1958_p0 = scmp.lt.u32.totalorder %s1950_s12, %s2702_s28 }
 0x30a   : > { %p1952_p8 = pnand %p1951_p7, %p1566_p12 }
 0x30b   : > { %p1957_p13 = por %p1956_p11, %p1955_p10 }
 0x30c   : > { %p1953_p9 = pneg %p1952_p8 }
 0x30d   : > { %p1959_p1 = por %p1958_p0, %p1957_p13 }
 0x30f   : > { %p1960_p2 = pnand %p1959_p1, %p1953_p9 }
 0x311   : > { %1963 = shalt.err (!%p1960_p2)
}
 0x312   : > { %s2001_s20 = smov 128   ;;  %s2002_s26 = smov 8  }
 0x313   : > { %1465 = dma.vmem_to_hbm [thread:$0]  (%p1566_p12), %s2705_s11, %s2693_s18, %s2702_s28, %s2688_s16, %s2001_s20, %s2001_s20, %s2002_s26  }
 0x314 PF: > { %p1837_p3 = scmp.ge.s32.totalorder %s1998_s24, 2  ;;  %s1474_s7 = sand.u32 1, %s1986_s21  }
 0x315   : > { %s1475_s29 = scalar_lea.sflag [#allocation3], %s1474_s7 }
 0x316   : > { %p1834_p4 = pnand %p1837_p3, %p2080_p6 }
 0x318   : > { %1981 = dma.done.wait (!%p1834_p4), %s1475_s29, 4096  }
 0x319   : > { %1983 = vsyncadd (!%p1834_p4), %s1475_s29, 4294963200  ;;  %p16_p5 = scmp.ge.s32.totalorder %s2063_s27, 4   ;;  %s2758_s21 = smov %s1990_s22 }
 0x31a   : > { %s2759_s22 = smov %s1994_s23  ;;  %s2760_s23 = smov %s2074_s30 }
 0x31b   : > { %s2761_s24 = smov %s2063_s27  ;;  %18 = sbr.rel (!%p16_p5) target bundleno = 3 (0x3), region = 79 }
 0x322   :  { %1480 = vsyncpa [#allocation3], 1 }
 0x323   :  { %1482 = vsyncpa [#allocation3 + $0x1], 1 }

</bundles_post_ra>
